<compile_context>
chip_gen: v7x
topology: tpu7x:2x2x1
jax: 0.10.0
libtpu: 0.0.40
codegen_flags: <defaults>
</compile_context>

<pallas_src>
import math
import functools

import jax
import jax.numpy as jnp
from jax.experimental import pallas as pl
from jax.experimental.pallas import tpu as pltpu


def _serial_cross_attn_kernel(B, Lq, H, S, q_ref, *refs):
    """Single grid step: the whole batch, processed through ALL sources serially."""
    bank_refs = refs[:S]
    bias_refs = refs[S:2 * S]
    (wq_ref, bq_ref, wkv_ref, bkv_ref, wo_ref, bo_ref,
     gamma_ref, beta_ref, out_ref, ctx_ref) = refs[2 * S:]

    D = q_ref.shape[-1]
    hd = D // H
    cdtype = wq_ref.dtype          # matmul-operand dtype (f32 or bf16)

    # Shared weights / biases: loaded once, reused for every source (hoisted).
    wq = wq_ref[...]               # [D, D]   (1/sqrt(hd) pre-folded)
    wkv = wkv_ref[...]             # [D, 2D]
    wo = wo_ref[...]               # [D, D]
    bq = bq_ref[...]               # [1, D]   f32 (pre-scaled)
    bkv = bkv_ref[...]             # [1, 2D]  f32
    bo = bo_ref[...]               # [1, D]   f32

    ori = q_ref[...].astype(jnp.float32)      # [B*Lq, D] residual source
    cur = ori                                  # stays resident across sources

    for s in range(S):                         # serial sources, fused in one kernel
        bank = bank_refs[s][...]               # [B*Ls, D]  cdtype
        Ls = bank.shape[0] // B

        # ---- fused projections: full-width MXU dots over the whole batch ----
        q_proj = jnp.dot(cur.astype(cdtype), wq,
                         preferred_element_type=jnp.float32) + bq     # [B*Lq, D]
        kv = jnp.dot(bank, wkv,
                     preferred_element_type=jnp.float32) + bkv        # [B*Ls, 2D]
        # one full-width operand cast per source (not per head)
        q_c = q_proj.astype(cdtype)
        k_c = kv[:, :D].astype(cdtype)
        v_c = kv[:, D:].astype(cdtype)

        for b in range(B):
            qb = q_c[b * Lq:(b + 1) * Lq, :]          # [Lq, D]
            kb = k_c[b * Ls:(b + 1) * Ls, :]          # [Ls, D]
            vb = v_c[b * Ls:(b + 1) * Ls, :]          # [Ls, D]

            # ---- scores: per-head dots, stacked head-major on sublanes ----
            sc = jnp.concatenate(
                [jax.lax.dot_general(qb[:, h * hd:(h + 1) * hd],
                                     kb[:, h * hd:(h + 1) * hd],
                                     (((1,), (1,)), ((), ())),
                                     preferred_element_type=jnp.float32)
                 for h in range(H)], axis=0)          # [H*Lq, Ls] f32

            # ---- masked softmax, batched over all heads at once ----
            sc = sc + bias_refs[s][b]                 # additive -1e18 pad bias [1, Ls]
            m = jnp.max(sc, axis=-1, keepdims=True)
            e = jnp.exp(sc - m)
            den = jnp.sum(e, axis=-1, keepdims=True)
            inv = pl.reciprocal(den, approx=True)     # EUP slot
            inv = inv * (2.0 - den * inv)             # one Newton step -> f32 accurate
            e_c = e.astype(cdtype)

            # ---- per-head context (unnormalized probs); deferred normalization;
            #      heads are written into the [B*Lq, D] scratch so the output
            #      projection below is ONE full-width dot ----
            for h in range(H):
                ctx_h = jnp.dot(e_c[h * Lq:(h + 1) * Lq, :],
                                vb[:, h * hd:(h + 1) * hd],
                                preferred_element_type=jnp.float32)    # [Lq, hd]
                ctx_ref[pl.ds(b * Lq, Lq), pl.ds(h * hd, hd)] = (
                    ctx_h * inv[h * Lq:(h + 1) * Lq, :])

        # ---- single output projection over the whole batch (contraction = D) ----
        attn_out = jnp.dot(ctx_ref[...].astype(cdtype), wo,
                           preferred_element_type=jnp.float32) + bo    # [B*Lq, D]

        # residual vs ORIGINAL query + LayerNorm(eps=1e-6); dropout = identity
        res = ori + attn_out
        mean = jnp.mean(res, axis=-1, keepdims=True)
        cen = res - mean
        var = jnp.mean(cen * cen, axis=-1, keepdims=True)
        cur = cen * jax.lax.rsqrt(var + 1e-6) * gamma_ref[s] + beta_ref[s]

    out_ref[...] = cur.astype(out_ref.dtype)


def multi_head_serial_cross_attention(query, src_mem_banks, src_pad_masks, params,
                                      num_heads, compute_dtype=jnp.float32):
    """Fused Pallas forward. `params` uses PyTorch layouts (w: [out, in])."""
    B, Lq, D = query.shape
    S = len(src_mem_banks)
    H = num_heads
    hd = D // H
    scale = 1.0 / math.sqrt(hd)
    cdtype = compute_dtype

    # --- re-layout PyTorch parameters (tiny, one-time glue in plain JAX) ---
    wq_t = (params['wq'].T * scale).astype(cdtype)                  # [D, D], scale folded
    bq = (params['bq'] * scale).reshape(1, D).astype(jnp.float32)
    wkv_t = params['wkv'].T.astype(cdtype)                          # [D, 2D]
    bkv = params['bkv'].reshape(1, 2 * D).astype(jnp.float32)
    wo_t = params['wo'].T.astype(cdtype)                            # [D, D]
    bo = params['bo'].reshape(1, D).astype(jnp.float32)
    gamma = jnp.stack([g.reshape(1, D) for g in params['gamma']]).astype(jnp.float32)
    beta = jnp.stack([b.reshape(1, D) for b in params['beta']]).astype(jnp.float32)

    # Inputs: fold batch into the row (sublane) axis outside the kernel, cast the
    # matmul operands (halves bank DMA bytes in the bf16 path -- valid on v5e
    # too), and precompute the pad mask as an additive bias.
    query_flat = query.reshape(B * Lq, D).astype(jnp.float32)
    banks_flat = [bk.reshape(B * bk.shape[1], D).astype(cdtype) for bk in src_mem_banks]
    biases = [jnp.where(m > 0.5, -1e18, 0.0).astype(jnp.float32)
              for m in src_pad_masks]                               # [B, 1, Ls] f32

    kernel = functools.partial(_serial_cross_attn_kernel, B, Lq, H, S)

    operands = [query_flat, *banks_flat, *biases,
                wq_t, bq, wkv_t, bkv, wo_t, bo, gamma, beta]

    def full_spec(arr):
        nd = arr.ndim
        return pl.BlockSpec(arr.shape, lambda i, _nd=nd: (0,) * _nd)

    in_specs = [full_spec(a) for a in operands]

    # --- advisory cost estimate for the surrounding XLA schedule ---
    flops = 0
    transcendentals = 0
    for bk in src_mem_banks:
        Ls = bk.shape[1]
        flops += 2 * B * (Lq * D * D          # Q projection
                          + Ls * D * 2 * D    # fused K|V projection
                          + 2 * Lq * Ls * D   # scores + context (all heads)
                          + Lq * D * D)       # output projection
        transcendentals += B * (H * Lq * Ls + H * Lq + Lq)   # exp + recip + rsqrt
    bytes_accessed = int(sum(a.size * a.dtype.itemsize for a in operands)
                         + B * Lq * D * 4)

    out_flat = pl.pallas_call(
        kernel,
        out_shape=jax.ShapeDtypeStruct((B * Lq, D), jnp.float32),
        grid=(1,),
        in_specs=in_specs,
        out_specs=pl.BlockSpec((B * Lq, D), lambda i: (0, 0)),
        scratch_shapes=[pltpu.VMEM((B * Lq, D), jnp.float32)],     # head-concat ctx
        compiler_params=pltpu.CompilerParams(
            dimension_semantics=("arbitrary",),
            vmem_limit_bytes=32 * 1024 * 1024),
        cost_estimate=pl.CostEstimate(flops=flops,
                                      transcendentals=transcendentals,
                                      bytes_accessed=bytes_accessed),
    )(*operands)
    return out_flat.reshape(B, Lq, D)


def reference_forward(query, banks, masks, p, num_heads):
    """Pure-JAX replica of the PyTorch forward (eval mode), highest precision."""
    B, Lq, D = query.shape
    H = num_heads
    hd = D // H
    hp = jax.lax.Precision.HIGHEST
    ori = query
    cur = query
    for idx, (bank, mask) in enumerate(zip(banks, masks)):
        Ls = bank.shape[1]
        kv = jnp.einsum('bsd,ed->bse', bank, p['wkv'], precision=hp) + p['bkv']
        kv = kv.reshape(B, Ls, 2, H, hd).transpose(2, 0, 3, 1, 4)
        k, v = kv[0], kv[1]                                   # [B,H,Ls,hd]
        q = jnp.einsum('bqd,ed->bqe', cur, p['wq'], precision=hp) + p['bq']
        q = q.reshape(B, Lq, H, hd).transpose(0, 2, 1, 3) / math.sqrt(hd)
        s = jnp.einsum('bhqe,bhke->bhqk', q, k, precision=hp)
        s = jnp.where(mask[:, None, :, :] > 0.5, -1e18, s)
        a = jax.nn.softmax(s, axis=-1)
        ctx = jnp.einsum('bhqk,bhke->bhqe', a, v, precision=hp)
        ctx = ctx.transpose(0, 2, 1, 3).reshape(B, Lq, D)
        out = jnp.einsum('bqd,ed->bqe', ctx, p['wo'], precision=hp) + p['bo']
        res = ori + out
        mean = res.mean(-1, keepdims=True)
        var = ((res - mean) ** 2).mean(-1, keepdims=True)
        cur = (res - mean) / jnp.sqrt(var + 1e-6) * p['gamma'][idx] + p['beta'][idx]
    return cur


if __name__ == "__main__":
    # Small shapes consistent with the module's forward.
    B, Lq, D, H, num_itr = 2, 8, 32, 4, 2
    src_lens = [8, 16]

    key = jax.random.PRNGKey(0)
    keys = iter(jax.random.split(key, 32))

    def rnd(shape, scale=0.1):
        return jax.random.normal(next(keys), shape, dtype=jnp.float32) * scale

    # Deterministic parameters in PyTorch layout ([out_features, in_features]).
    wq = rnd((D, D)); bq = rnd((D,))
    wkv = rnd((2 * D, D)); bkv = rnd((2 * D,))
    wo = rnd((D, D)); bo = rnd((D,))
    ln_gamma = [jnp.ones((D,), jnp.float32) + rnd((D,), 0.01) for _ in range(num_itr)]
    ln_beta = [rnd((D,), 0.01) for _ in range(num_itr)]
    torch_params = dict(wq=wq, bq=bq, wkv=wkv, bkv=bkv, wo=wo, bo=bo,
                        gamma=ln_gamma, beta=ln_beta)

    # Deterministic inputs.
    query = rnd((B, Lq, D), 1.0)
    banks = [rnd((B, L, D), 1.0) for L in src_lens]
    masks = []
    for L in src_lens:
        m = jnp.zeros((B, 1, L), jnp.float32)
        m = m.at[:, :, L - 2:].set(1.0)   # last two source positions are padding
        masks.append(m)

    ref = reference_forward(query, banks, masks, torch_params, H)

    # f32-operand path: tight tolerance catches layout / indexing regressions.
    out_f32 = multi_head_serial_cross_attention(query, banks, masks, torch_params, H,
                                                compute_dtype=jnp.float32)
    out_f32 = jax.block_until_ready(out_f32)
    err_f32 = float(jnp.max(jnp.abs(out_f32 - ref)))
    assert err_f32 < 1e-3, f"f32 mismatch vs reference: max abs err = {err_f32}"

    # bf16-operand path (MXU fast path on every generation, incl. v5e): tolerance
    # reflects bf16 operand rounding only -- accumulation/softmax/LN remain f32.
    out_bf16 = multi_head_serial_cross_attention(query, banks, masks, torch_params, H,
                                                 compute_dtype=jnp.bfloat16)
    out_bf16 = jax.block_until_ready(out_bf16)
    err_bf16 = float(jnp.max(jnp.abs(out_bf16 - ref)))
    assert err_bf16 < 5e-2, f"bf16 mismatch vs reference: max abs err = {err_bf16}"

    print("KERNEL_OK")
</pallas_src>

<mosaic_0001>
module attributes {stable_mosaic.version = 11 : i64} {
  func.func @_serial_cross_attn_kernel(%arg0: i32, %arg1: memref<16x32xf32, #tpu.memory_space<vmem>>, %arg2: memref<16x32xf32, #tpu.memory_space<vmem>>, %arg3: memref<32x32xf32, #tpu.memory_space<vmem>>, %arg4: memref<2x1x8xf32, #tpu.memory_space<vmem>>, %arg5: memref<2x1x16xf32, #tpu.memory_space<vmem>>, %arg6: memref<32x32xf32, #tpu.memory_space<vmem>>, %arg7: memref<1x32xf32, #tpu.memory_space<vmem>>, %arg8: memref<32x64xf32, #tpu.memory_space<vmem>>, %arg9: memref<1x64xf32, #tpu.memory_space<vmem>>, %arg10: memref<32x32xf32, #tpu.memory_space<vmem>>, %arg11: memref<1x32xf32, #tpu.memory_space<vmem>>, %arg12: memref<2x1x32xf32, #tpu.memory_space<vmem>>, %arg13: memref<2x1x32xf32, #tpu.memory_space<vmem>>, %arg14: memref<16x32xf32, #tpu.memory_space<vmem>>, %arg15: memref<16x32xf32, #tpu.memory_space<vmem>>) attributes {dimension_semantics = [#tpu.dimension_semantics<arbitrary>], iteration_bounds = array<i64: 1>, scalar_prefetch = 0 : i64, scratch_operands = 1 : i64, tpu.core_type = #tpu.core_type<tc>, window_params = [{pipeline_mode = #tpu.pipeline_mode<synchronous>, transform_indices = @transform_0, window_bounds = array<i64: 16, 32>}, {pipeline_mode = #tpu.pipeline_mode<synchronous>, transform_indices = @transform_1, window_bounds = array<i64: 16, 32>}, {pipeline_mode = #tpu.pipeline_mode<synchronous>, transform_indices = @transform_2, window_bounds = array<i64: 32, 32>}, {pipeline_mode = #tpu.pipeline_mode<synchronous>, transform_indices = @transform_3, window_bounds = array<i64: 2, 1, 8>}, {pipeline_mode = #tpu.pipeline_mode<synchronous>, transform_indices = @transform_4, window_bounds = array<i64: 2, 1, 16>}, {pipeline_mode = #tpu.pipeline_mode<synchronous>, transform_indices = @transform_5, window_bounds = array<i64: 32, 32>}, {pipeline_mode = #tpu.pipeline_mode<synchronous>, transform_indices = @transform_6, window_bounds = array<i64: 1, 32>}, {pipeline_mode = #tpu.pipeline_mode<synchronous>, transform_indices = @transform_7, window_bounds = array<i64: 32, 64>}, {pipeline_mode = #tpu.pipeline_mode<synchronous>, transform_indices = @transform_8, window_bounds = array<i64: 1, 64>}, {pipeline_mode = #tpu.pipeline_mode<synchronous>, transform_indices = @transform_9, window_bounds = array<i64: 32, 32>}, {pipeline_mode = #tpu.pipeline_mode<synchronous>, transform_indices = @transform_10, window_bounds = array<i64: 1, 32>}, {pipeline_mode = #tpu.pipeline_mode<synchronous>, transform_indices = @transform_11, window_bounds = array<i64: 2, 1, 32>}, {pipeline_mode = #tpu.pipeline_mode<synchronous>, transform_indices = @transform_12, window_bounds = array<i64: 2, 1, 32>}, {pipeline_mode = #tpu.pipeline_mode<synchronous>, transform_indices = @transform_13, window_bounds = array<i64: 16, 32>}]} {
    %c0 = arith.constant 0 : index
    %c0_0 = arith.constant 0 : index
    %0 = vector.load %arg6[%c0, %c0_0] : memref<32x32xf32, #tpu.memory_space<vmem>>, vector<32x32xf32>
    %c0_1 = arith.constant 0 : index
    %c0_2 = arith.constant 0 : index
    %1 = vector.load %arg8[%c0_1, %c0_2] : memref<32x64xf32, #tpu.memory_space<vmem>>, vector<32x64xf32>
    %c0_3 = arith.constant 0 : index
    %c0_4 = arith.constant 0 : index
    %2 = vector.load %arg10[%c0_3, %c0_4] : memref<32x32xf32, #tpu.memory_space<vmem>>, vector<32x32xf32>
    %c0_5 = arith.constant 0 : index
    %c0_6 = arith.constant 0 : index
    %3 = vector.load %arg7[%c0_5, %c0_6] : memref<1x32xf32, #tpu.memory_space<vmem>>, vector<1x32xf32>
    %c0_7 = arith.constant 0 : index
    %c0_8 = arith.constant 0 : index
    %4 = vector.load %arg9[%c0_7, %c0_8] : memref<1x64xf32, #tpu.memory_space<vmem>>, vector<1x64xf32>
    %c0_9 = arith.constant 0 : index
    %c0_10 = arith.constant 0 : index
    %5 = vector.load %arg11[%c0_9, %c0_10] : memref<1x32xf32, #tpu.memory_space<vmem>>, vector<1x32xf32>
    %c0_11 = arith.constant 0 : index
    %c0_12 = arith.constant 0 : index
    %6 = vector.load %arg1[%c0_11, %c0_12] : memref<16x32xf32, #tpu.memory_space<vmem>>, vector<16x32xf32>
    %c0_13 = arith.constant 0 : index
    %c0_14 = arith.constant 0 : index
    %7 = vector.load %arg2[%c0_13, %c0_14] : memref<16x32xf32, #tpu.memory_space<vmem>>, vector<16x32xf32>
    %cst = arith.constant dense<0.000000e+00> : vector<16x32xf32>
    %8 = tpu.matmul %6, %0, %cst {dimension_numbers = #tpu.dot_dimension_numbers<[1], [0], [0], [1], [0, 0, 1, 1], [], []>} : vector<16x32xf32>, vector<32x32xf32>, vector<16x32xf32> -> vector<16x32xf32>
    %9 = vector.broadcast %3 : vector<1x32xf32> to vector<16x32xf32>
    %10 = arith.addf %8, %9 : vector<16x32xf32>
    %cst_15 = arith.constant dense<0.000000e+00> : vector<16x64xf32>
    %11 = tpu.matmul %7, %1, %cst_15 {dimension_numbers = #tpu.dot_dimension_numbers<[1], [0], [0], [1], [0, 0, 1, 1], [], []>} : vector<16x32xf32>, vector<32x64xf32>, vector<16x64xf32> -> vector<16x64xf32>
    %12 = vector.broadcast %4 : vector<1x64xf32> to vector<16x64xf32>
    %13 = arith.addf %11, %12 : vector<16x64xf32>
    %14 = vector.extract_strided_slice %13 {offsets = [0, 0], sizes = [16, 32], strides = [1, 1]} : vector<16x64xf32> to vector<16x32xf32>
    %15 = vector.extract_strided_slice %13 {offsets = [0, 32], sizes = [16, 32], strides = [1, 1]} : vector<16x64xf32> to vector<16x32xf32>
    %16 = vector.extract_strided_slice %10 {offsets = [0, 0], sizes = [8, 32], strides = [1, 1]} : vector<16x32xf32> to vector<8x32xf32>
    %17 = vector.extract_strided_slice %14 {offsets = [0, 0], sizes = [8, 32], strides = [1, 1]} : vector<16x32xf32> to vector<8x32xf32>
    %18 = vector.extract_strided_slice %15 {offsets = [0, 0], sizes = [8, 32], strides = [1, 1]} : vector<16x32xf32> to vector<8x32xf32>
    %19 = vector.extract_strided_slice %16 {offsets = [0, 0], sizes = [8, 8], strides = [1, 1]} : vector<8x32xf32> to vector<8x8xf32>
    %20 = vector.extract_strided_slice %17 {offsets = [0, 0], sizes = [8, 8], strides = [1, 1]} : vector<8x32xf32> to vector<8x8xf32>
    %cst_16 = arith.constant dense<0.000000e+00> : vector<8x8xf32>
    %21 = tpu.matmul %19, %20, %cst_16 {dimension_numbers = #tpu.dot_dimension_numbers<[1], [1], [0], [0], [0, 0, 1, 0], [], []>} : vector<8x8xf32>, vector<8x8xf32>, vector<8x8xf32> -> vector<8x8xf32>
    %22 = vector.extract_strided_slice %16 {offsets = [0, 8], sizes = [8, 8], strides = [1, 1]} : vector<8x32xf32> to vector<8x8xf32>
    %23 = vector.extract_strided_slice %17 {offsets = [0, 8], sizes = [8, 8], strides = [1, 1]} : vector<8x32xf32> to vector<8x8xf32>
    %cst_17 = arith.constant dense<0.000000e+00> : vector<8x8xf32>
    %24 = tpu.matmul %22, %23, %cst_17 {dimension_numbers = #tpu.dot_dimension_numbers<[1], [1], [0], [0], [0, 0, 1, 0], [], []>} : vector<8x8xf32>, vector<8x8xf32>, vector<8x8xf32> -> vector<8x8xf32>
    %25 = vector.extract_strided_slice %16 {offsets = [0, 16], sizes = [8, 8], strides = [1, 1]} : vector<8x32xf32> to vector<8x8xf32>
    %26 = vector.extract_strided_slice %17 {offsets = [0, 16], sizes = [8, 8], strides = [1, 1]} : vector<8x32xf32> to vector<8x8xf32>
    %cst_18 = arith.constant dense<0.000000e+00> : vector<8x8xf32>
    %27 = tpu.matmul %25, %26, %cst_18 {dimension_numbers = #tpu.dot_dimension_numbers<[1], [1], [0], [0], [0, 0, 1, 0], [], []>} : vector<8x8xf32>, vector<8x8xf32>, vector<8x8xf32> -> vector<8x8xf32>
    %28 = vector.extract_strided_slice %16 {offsets = [0, 24], sizes = [8, 8], strides = [1, 1]} : vector<8x32xf32> to vector<8x8xf32>
    %29 = vector.extract_strided_slice %17 {offsets = [0, 24], sizes = [8, 8], strides = [1, 1]} : vector<8x32xf32> to vector<8x8xf32>
    %cst_19 = arith.constant dense<0.000000e+00> : vector<8x8xf32>
    %30 = tpu.matmul %28, %29, %cst_19 {dimension_numbers = #tpu.dot_dimension_numbers<[1], [1], [0], [0], [0, 0, 1, 0], [], []>} : vector<8x8xf32>, vector<8x8xf32>, vector<8x8xf32> -> vector<8x8xf32>
    %31 = tpu.concatenate %21, %24, %27, %30 in 0 : vector<8x8xf32>, vector<8x8xf32>, vector<8x8xf32>, vector<8x8xf32> -> vector<32x8xf32>
    %c0_20 = arith.constant 0 : index
    %c0_21 = arith.constant 0 : index
    %c0_22 = arith.constant 0 : index
    %32 = vector.load %arg4[%c0_20, %c0_21, %c0_22] : memref<2x1x8xf32, #tpu.memory_space<vmem>>, vector<1x1x8xf32>
    %33 = vector.shape_cast %32 : vector<1x1x8xf32> to vector<1x8xf32>
    %34 = vector.broadcast %33 : vector<1x8xf32> to vector<32x8xf32>
    %35 = arith.addf %31, %34 : vector<32x8xf32>
    %cst_23 = arith.constant dense<0xFF800000> : vector<32xf32>
    %36 = vector.multi_reduction <maximumf>, %35, %cst_23 [1] : vector<32x8xf32> to vector<32xf32>
    %37 = vector.shape_cast %36 : vector<32xf32> to vector<32x1xf32>
    %38 = vector.broadcast %37 : vector<32x1xf32> to vector<32x8xf32>
    %39 = arith.subf %35, %38 : vector<32x8xf32>
    %40 = math.exp %39 : vector<32x8xf32>
    %cst_24 = arith.constant dense<0.000000e+00> : vector<32xf32>
    %41 = vector.multi_reduction <add>, %40, %cst_24 [1] : vector<32x8xf32> to vector<32xf32>
    %42 = vector.shape_cast %41 : vector<32xf32> to vector<32x1xf32>
    %43 = tpu.reciprocal %42 {approx = true} : vector<32x1xf32> -> vector<32x1xf32>
    %44 = arith.mulf %42, %43 : vector<32x1xf32>
    %cst_25 = arith.constant 2.000000e+00 : f32
    %45 = vector.broadcast %cst_25 : f32 to vector<32x1xf32>
    %46 = arith.subf %45, %44 : vector<32x1xf32>
    %47 = arith.mulf %43, %46 : vector<32x1xf32>
    %48 = vector.extract_strided_slice %40 {offsets = [0, 0], sizes = [8, 8], strides = [1, 1]} : vector<32x8xf32> to vector<8x8xf32>
    %49 = vector.extract_strided_slice %18 {offsets = [0, 0], sizes = [8, 8], strides = [1, 1]} : vector<8x32xf32> to vector<8x8xf32>
    %cst_26 = arith.constant dense<0.000000e+00> : vector<8x8xf32>
    %50 = tpu.matmul %48, %49, %cst_26 {dimension_numbers = #tpu.dot_dimension_numbers<[1], [0], [0], [1], [0, 0, 1, 1], [], []>} : vector<8x8xf32>, vector<8x8xf32>, vector<8x8xf32> -> vector<8x8xf32>
    %51 = vector.extract_strided_slice %47 {offsets = [0, 0], sizes = [8, 1], strides = [1, 1]} : vector<32x1xf32> to vector<8x1xf32>
    %52 = vector.broadcast %51 : vector<8x1xf32> to vector<8x8xf32>
    %53 = arith.mulf %50, %52 : vector<8x8xf32>
    %c0_27 = arith.constant 0 : index
    %c0_28 = arith.constant 0 : index
    %54 = vector.load %arg15[%c0_27, %c0_28] : memref<16x32xf32, #tpu.memory_space<vmem>>, vector<8x8xf32>
    tpu.vector_store %arg15[%c0_27, %c0_28], %53 {strides = array<i32>} : memref<16x32xf32, #tpu.memory_space<vmem>>, vector<8x8xf32>,
    %55 = vector.extract_strided_slice %40 {offsets = [8, 0], sizes = [8, 8], strides = [1, 1]} : vector<32x8xf32> to vector<8x8xf32>
    %56 = vector.extract_strided_slice %18 {offsets = [0, 8], sizes = [8, 8], strides = [1, 1]} : vector<8x32xf32> to vector<8x8xf32>
    %cst_29 = arith.constant dense<0.000000e+00> : vector<8x8xf32>
    %57 = tpu.matmul %55, %56, %cst_29 {dimension_numbers = #tpu.dot_dimension_numbers<[1], [0], [0], [1], [0, 0, 1, 1], [], []>} : vector<8x8xf32>, vector<8x8xf32>, vector<8x8xf32> -> vector<8x8xf32>
    %58 = vector.extract_strided_slice %47 {offsets = [8, 0], sizes = [8, 1], strides = [1, 1]} : vector<32x1xf32> to vector<8x1xf32>
    %59 = vector.broadcast %58 : vector<8x1xf32> to vector<8x8xf32>
    %60 = arith.mulf %57, %59 : vector<8x8xf32>
    %c0_30 = arith.constant 0 : index
    %c8 = arith.constant 8 : index
    %61 = vector.load %arg15[%c0_30, %c8] : memref<16x32xf32, #tpu.memory_space<vmem>>, vector<8x8xf32>
    tpu.vector_store %arg15[%c0_30, %c8], %60 {strides = array<i32>} : memref<16x32xf32, #tpu.memory_space<vmem>>, vector<8x8xf32>,
    %62 = vector.extract_strided_slice %40 {offsets = [16, 0], sizes = [8, 8], strides = [1, 1]} : vector<32x8xf32> to vector<8x8xf32>
    %63 = vector.extract_strided_slice %18 {offsets = [0, 16], sizes = [8, 8], strides = [1, 1]} : vector<8x32xf32> to vector<8x8xf32>
    %cst_31 = arith.constant dense<0.000000e+00> : vector<8x8xf32>
    %64 = tpu.matmul %62, %63, %cst_31 {dimension_numbers = #tpu.dot_dimension_numbers<[1], [0], [0], [1], [0, 0, 1, 1], [], []>} : vector<8x8xf32>, vector<8x8xf32>, vector<8x8xf32> -> vector<8x8xf32>
    %65 = vector.extract_strided_slice %47 {offsets = [16, 0], sizes = [8, 1], strides = [1, 1]} : vector<32x1xf32> to vector<8x1xf32>
    %66 = vector.broadcast %65 : vector<8x1xf32> to vector<8x8xf32>
    %67 = arith.mulf %64, %66 : vector<8x8xf32>
    %c0_32 = arith.constant 0 : index
    %c16 = arith.constant 16 : index
    %68 = vector.load %arg15[%c0_32, %c16] : memref<16x32xf32, #tpu.memory_space<vmem>>, vector<8x8xf32>
    tpu.vector_store %arg15[%c0_32, %c16], %67 {strides = array<i32>} : memref<16x32xf32, #tpu.memory_space<vmem>>, vector<8x8xf32>,
    %69 = vector.extract_strided_slice %40 {offsets = [24, 0], sizes = [8, 8], strides = [1, 1]} : vector<32x8xf32> to vector<8x8xf32>
    %70 = vector.extract_strided_slice %18 {offsets = [0, 24], sizes = [8, 8], strides = [1, 1]} : vector<8x32xf32> to vector<8x8xf32>
    %cst_33 = arith.constant dense<0.000000e+00> : vector<8x8xf32>
    %71 = tpu.matmul %69, %70, %cst_33 {dimension_numbers = #tpu.dot_dimension_numbers<[1], [0], [0], [1], [0, 0, 1, 1], [], []>} : vector<8x8xf32>, vector<8x8xf32>, vector<8x8xf32> -> vector<8x8xf32>
    %72 = vector.extract_strided_slice %47 {offsets = [24, 0], sizes = [8, 1], strides = [1, 1]} : vector<32x1xf32> to vector<8x1xf32>
    %73 = vector.broadcast %72 : vector<8x1xf32> to vector<8x8xf32>
    %74 = arith.mulf %71, %73 : vector<8x8xf32>
    %c0_34 = arith.constant 0 : index
    %c24 = arith.constant 24 : index
    %75 = vector.load %arg15[%c0_34, %c24] : memref<16x32xf32, #tpu.memory_space<vmem>>, vector<8x8xf32>
    tpu.vector_store %arg15[%c0_34, %c24], %74 {strides = array<i32>} : memref<16x32xf32, #tpu.memory_space<vmem>>, vector<8x8xf32>,
    %76 = vector.extract_strided_slice %10 {offsets = [8, 0], sizes = [8, 32], strides = [1, 1]} : vector<16x32xf32> to vector<8x32xf32>
    %77 = vector.extract_strided_slice %14 {offsets = [8, 0], sizes = [8, 32], strides = [1, 1]} : vector<16x32xf32> to vector<8x32xf32>
    %78 = vector.extract_strided_slice %15 {offsets = [8, 0], sizes = [8, 32], strides = [1, 1]} : vector<16x32xf32> to vector<8x32xf32>
    %79 = vector.extract_strided_slice %76 {offsets = [0, 0], sizes = [8, 8], strides = [1, 1]} : vector<8x32xf32> to vector<8x8xf32>
    %80 = vector.extract_strided_slice %77 {offsets = [0, 0], sizes = [8, 8], strides = [1, 1]} : vector<8x32xf32> to vector<8x8xf32>
    %cst_35 = arith.constant dense<0.000000e+00> : vector<8x8xf32>
    %81 = tpu.matmul %79, %80, %cst_35 {dimension_numbers = #tpu.dot_dimension_numbers<[1], [1], [0], [0], [0, 0, 1, 0], [], []>} : vector<8x8xf32>, vector<8x8xf32>, vector<8x8xf32> -> vector<8x8xf32>
    %82 = vector.extract_strided_slice %76 {offsets = [0, 8], sizes = [8, 8], strides = [1, 1]} : vector<8x32xf32> to vector<8x8xf32>
    %83 = vector.extract_strided_slice %77 {offsets = [0, 8], sizes = [8, 8], strides = [1, 1]} : vector<8x32xf32> to vector<8x8xf32>
    %cst_36 = arith.constant dense<0.000000e+00> : vector<8x8xf32>
    %84 = tpu.matmul %82, %83, %cst_36 {dimension_numbers = #tpu.dot_dimension_numbers<[1], [1], [0], [0], [0, 0, 1, 0], [], []>} : vector<8x8xf32>, vector<8x8xf32>, vector<8x8xf32> -> vector<8x8xf32>
    %85 = vector.extract_strided_slice %76 {offsets = [0, 16], sizes = [8, 8], strides = [1, 1]} : vector<8x32xf32> to vector<8x8xf32>
    %86 = vector.extract_strided_slice %77 {offsets = [0, 16], sizes = [8, 8], strides = [1, 1]} : vector<8x32xf32> to vector<8x8xf32>
    %cst_37 = arith.constant dense<0.000000e+00> : vector<8x8xf32>
    %87 = tpu.matmul %85, %86, %cst_37 {dimension_numbers = #tpu.dot_dimension_numbers<[1], [1], [0], [0], [0, 0, 1, 0], [], []>} : vector<8x8xf32>, vector<8x8xf32>, vector<8x8xf32> -> vector<8x8xf32>
    %88 = vector.extract_strided_slice %76 {offsets = [0, 24], sizes = [8, 8], strides = [1, 1]} : vector<8x32xf32> to vector<8x8xf32>
    %89 = vector.extract_strided_slice %77 {offsets = [0, 24], sizes = [8, 8], strides = [1, 1]} : vector<8x32xf32> to vector<8x8xf32>
    %cst_38 = arith.constant dense<0.000000e+00> : vector<8x8xf32>
    %90 = tpu.matmul %88, %89, %cst_38 {dimension_numbers = #tpu.dot_dimension_numbers<[1], [1], [0], [0], [0, 0, 1, 0], [], []>} : vector<8x8xf32>, vector<8x8xf32>, vector<8x8xf32> -> vector<8x8xf32>
    %91 = tpu.concatenate %81, %84, %87, %90 in 0 : vector<8x8xf32>, vector<8x8xf32>, vector<8x8xf32>, vector<8x8xf32> -> vector<32x8xf32>
    %c1 = arith.constant 1 : index
    %c0_39 = arith.constant 0 : index
    %c0_40 = arith.constant 0 : index
    %92 = vector.load %arg4[%c1, %c0_39, %c0_40] : memref<2x1x8xf32, #tpu.memory_space<vmem>>, vector<1x1x8xf32>
    %93 = vector.shape_cast %92 : vector<1x1x8xf32> to vector<1x8xf32>
    %94 = vector.broadcast %93 : vector<1x8xf32> to vector<32x8xf32>
    %95 = arith.addf %91, %94 : vector<32x8xf32>
    %cst_41 = arith.constant dense<0xFF800000> : vector<32xf32>
    %96 = vector.multi_reduction <maximumf>, %95, %cst_41 [1] : vector<32x8xf32> to vector<32xf32>
    %97 = vector.shape_cast %96 : vector<32xf32> to vector<32x1xf32>
    %98 = vector.broadcast %97 : vector<32x1xf32> to vector<32x8xf32>
    %99 = arith.subf %95, %98 : vector<32x8xf32>
    %100 = math.exp %99 : vector<32x8xf32>
    %cst_42 = arith.constant dense<0.000000e+00> : vector<32xf32>
    %101 = vector.multi_reduction <add>, %100, %cst_42 [1] : vector<32x8xf32> to vector<32xf32>
    %102 = vector.shape_cast %101 : vector<32xf32> to vector<32x1xf32>
    %103 = tpu.reciprocal %102 {approx = true} : vector<32x1xf32> -> vector<32x1xf32>
    %104 = arith.mulf %102, %103 : vector<32x1xf32>
    %cst_43 = arith.constant 2.000000e+00 : f32
    %105 = vector.broadcast %cst_43 : f32 to vector<32x1xf32>
    %106 = arith.subf %105, %104 : vector<32x1xf32>
    %107 = arith.mulf %103, %106 : vector<32x1xf32>
    %108 = vector.extract_strided_slice %100 {offsets = [0, 0], sizes = [8, 8], strides = [1, 1]} : vector<32x8xf32> to vector<8x8xf32>
    %109 = vector.extract_strided_slice %78 {offsets = [0, 0], sizes = [8, 8], strides = [1, 1]} : vector<8x32xf32> to vector<8x8xf32>
    %cst_44 = arith.constant dense<0.000000e+00> : vector<8x8xf32>
    %110 = tpu.matmul %108, %109, %cst_44 {dimension_numbers = #tpu.dot_dimension_numbers<[1], [0], [0], [1], [0, 0, 1, 1], [], []>} : vector<8x8xf32>, vector<8x8xf32>, vector<8x8xf32> -> vector<8x8xf32>
    %111 = vector.extract_strided_slice %107 {offsets = [0, 0], sizes = [8, 1], strides = [1, 1]} : vector<32x1xf32> to vector<8x1xf32>
    %112 = vector.broadcast %111 : vector<8x1xf32> to vector<8x8xf32>
    %113 = arith.mulf %110, %112 : vector<8x8xf32>
    %c8_45 = arith.constant 8 : index
    %c0_46 = arith.constant 0 : index
    %114 = vector.load %arg15[%c8_45, %c0_46] : memref<16x32xf32, #tpu.memory_space<vmem>>, vector<8x8xf32>
    tpu.vector_store %arg15[%c8_45, %c0_46], %113 {strides = array<i32>} : memref<16x32xf32, #tpu.memory_space<vmem>>, vector<8x8xf32>,
    %115 = vector.extract_strided_slice %100 {offsets = [8, 0], sizes = [8, 8], strides = [1, 1]} : vector<32x8xf32> to vector<8x8xf32>
    %116 = vector.extract_strided_slice %78 {offsets = [0, 8], sizes = [8, 8], strides = [1, 1]} : vector<8x32xf32> to vector<8x8xf32>
    %cst_47 = arith.constant dense<0.000000e+00> : vector<8x8xf32>
    %117 = tpu.matmul %115, %116, %cst_47 {dimension_numbers = #tpu.dot_dimension_numbers<[1], [0], [0], [1], [0, 0, 1, 1], [], []>} : vector<8x8xf32>, vector<8x8xf32>, vector<8x8xf32> -> vector<8x8xf32>
    %118 = vector.extract_strided_slice %107 {offsets = [8, 0], sizes = [8, 1], strides = [1, 1]} : vector<32x1xf32> to vector<8x1xf32>
    %119 = vector.broadcast %118 : vector<8x1xf32> to vector<8x8xf32>
    %120 = arith.mulf %117, %119 : vector<8x8xf32>
    %c8_48 = arith.constant 8 : index
    %c8_49 = arith.constant 8 : index
    %121 = vector.load %arg15[%c8_48, %c8_49] : memref<16x32xf32, #tpu.memory_space<vmem>>, vector<8x8xf32>
    tpu.vector_store %arg15[%c8_48, %c8_49], %120 {strides = array<i32>} : memref<16x32xf32, #tpu.memory_space<vmem>>, vector<8x8xf32>,
    %122 = vector.extract_strided_slice %100 {offsets = [16, 0], sizes = [8, 8], strides = [1, 1]} : vector<32x8xf32> to vector<8x8xf32>
    %123 = vector.extract_strided_slice %78 {offsets = [0, 16], sizes = [8, 8], strides = [1, 1]} : vector<8x32xf32> to vector<8x8xf32>
    %cst_50 = arith.constant dense<0.000000e+00> : vector<8x8xf32>
    %124 = tpu.matmul %122, %123, %cst_50 {dimension_numbers = #tpu.dot_dimension_numbers<[1], [0], [0], [1], [0, 0, 1, 1], [], []>} : vector<8x8xf32>, vector<8x8xf32>, vector<8x8xf32> -> vector<8x8xf32>
    %125 = vector.extract_strided_slice %107 {offsets = [16, 0], sizes = [8, 1], strides = [1, 1]} : vector<32x1xf32> to vector<8x1xf32>
    %126 = vector.broadcast %125 : vector<8x1xf32> to vector<8x8xf32>
    %127 = arith.mulf %124, %126 : vector<8x8xf32>
    %c8_51 = arith.constant 8 : index
    %c16_52 = arith.constant 16 : index
    %128 = vector.load %arg15[%c8_51, %c16_52] : memref<16x32xf32, #tpu.memory_space<vmem>>, vector<8x8xf32>
    tpu.vector_store %arg15[%c8_51, %c16_52], %127 {strides = array<i32>} : memref<16x32xf32, #tpu.memory_space<vmem>>, vector<8x8xf32>,
    %129 = vector.extract_strided_slice %100 {offsets = [24, 0], sizes = [8, 8], strides = [1, 1]} : vector<32x8xf32> to vector<8x8xf32>
    %130 = vector.extract_strided_slice %78 {offsets = [0, 24], sizes = [8, 8], strides = [1, 1]} : vector<8x32xf32> to vector<8x8xf32>
    %cst_53 = arith.constant dense<0.000000e+00> : vector<8x8xf32>
    %131 = tpu.matmul %129, %130, %cst_53 {dimension_numbers = #tpu.dot_dimension_numbers<[1], [0], [0], [1], [0, 0, 1, 1], [], []>} : vector<8x8xf32>, vector<8x8xf32>, vector<8x8xf32> -> vector<8x8xf32>
    %132 = vector.extract_strided_slice %107 {offsets = [24, 0], sizes = [8, 1], strides = [1, 1]} : vector<32x1xf32> to vector<8x1xf32>
    %133 = vector.broadcast %132 : vector<8x1xf32> to vector<8x8xf32>
    %134 = arith.mulf %131, %133 : vector<8x8xf32>
    %c8_54 = arith.constant 8 : index
    %c24_55 = arith.constant 24 : index
    %135 = vector.load %arg15[%c8_54, %c24_55] : memref<16x32xf32, #tpu.memory_space<vmem>>, vector<8x8xf32>
    tpu.vector_store %arg15[%c8_54, %c24_55], %134 {strides = array<i32>} : memref<16x32xf32, #tpu.memory_space<vmem>>, vector<8x8xf32>,
    %c0_56 = arith.constant 0 : index
    %c0_57 = arith.constant 0 : index
    %136 = vector.load %arg15[%c0_56, %c0_57] : memref<16x32xf32, #tpu.memory_space<vmem>>, vector<16x32xf32>
    %cst_58 = arith.constant dense<0.000000e+00> : vector<16x32xf32>
    %137 = tpu.matmul %136, %2, %cst_58 {dimension_numbers = #tpu.dot_dimension_numbers<[1], [0], [0], [1], [0, 0, 1, 1], [], []>} : vector<16x32xf32>, vector<32x32xf32>, vector<16x32xf32> -> vector<16x32xf32>
    %138 = vector.broadcast %5 : vector<1x32xf32> to vector<16x32xf32>
    %139 = arith.addf %137, %138 : vector<16x32xf32>
    %140 = arith.addf %6, %139 : vector<16x32xf32>
    %cst_59 = arith.constant dense<0.000000e+00> : vector<16xf32>
    %141 = vector.multi_reduction <add>, %140, %cst_59 [1] : vector<16x32xf32> to vector<16xf32>
    %142 = vector.shape_cast %141 : vector<16xf32> to vector<16x1xf32>
    %cst_60 = arith.constant 3.200000e+01 : f32
    %143 = vector.broadcast %cst_60 : f32 to vector<16x1xf32>
    %144 = arith.divf %142, %143 : vector<16x1xf32>
    %145 = vector.broadcast %144 : vector<16x1xf32> to vector<16x32xf32>
    %146 = arith.subf %140, %145 : vector<16x32xf32>
    %147 = arith.mulf %146, %146 : vector<16x32xf32>
    %cst_61 = arith.constant dense<0.000000e+00> : vector<16xf32>
    %148 = vector.multi_reduction <add>, %147, %cst_61 [1] : vector<16x32xf32> to vector<16xf32>
    %149 = vector.shape_cast %148 : vector<16xf32> to vector<16x1xf32>
    %cst_62 = arith.constant 3.200000e+01 : f32
    %150 = vector.broadcast %cst_62 : f32 to vector<16x1xf32>
    %151 = arith.divf %149, %150 : vector<16x1xf32>
    %cst_63 = arith.constant 9.99999997E-7 : f32
    %152 = vector.broadcast %cst_63 : f32 to vector<16x1xf32>
    %153 = arith.addf %151, %152 : vector<16x1xf32>
    %154 = math.rsqrt %153 : vector<16x1xf32>
    %155 = vector.broadcast %154 : vector<16x1xf32> to vector<16x32xf32>
    %156 = arith.mulf %146, %155 : vector<16x32xf32>
    %c0_64 = arith.constant 0 : index
    %c0_65 = arith.constant 0 : index
    %c0_66 = arith.constant 0 : index
    %157 = vector.load %arg12[%c0_64, %c0_65, %c0_66] : memref<2x1x32xf32, #tpu.memory_space<vmem>>, vector<1x1x32xf32>
    %158 = vector.shape_cast %157 : vector<1x1x32xf32> to vector<1x32xf32>
    %159 = vector.broadcast %158 : vector<1x32xf32> to vector<16x32xf32>
    %160 = arith.mulf %156, %159 : vector<16x32xf32>
    %c0_67 = arith.constant 0 : index
    %c0_68 = arith.constant 0 : index
    %c0_69 = arith.constant 0 : index
    %161 = vector.load %arg13[%c0_67, %c0_68, %c0_69] : memref<2x1x32xf32, #tpu.memory_space<vmem>>, vector<1x1x32xf32>
    %162 = vector.shape_cast %161 : vector<1x1x32xf32> to vector<1x32xf32>
    %163 = vector.broadcast %162 : vector<1x32xf32> to vector<16x32xf32>
    %164 = arith.addf %160, %163 : vector<16x32xf32>
    %c0_70 = arith.constant 0 : index
    %c0_71 = arith.constant 0 : index
    %165 = vector.load %arg3[%c0_70, %c0_71] : memref<32x32xf32, #tpu.memory_space<vmem>>, vector<32x32xf32>
    %cst_72 = arith.constant dense<0.000000e+00> : vector<16x32xf32>
    %166 = tpu.matmul %164, %0, %cst_72 {dimension_numbers = #tpu.dot_dimension_numbers<[1], [0], [0], [1], [0, 0, 1, 1], [], []>} : vector<16x32xf32>, vector<32x32xf32>, vector<16x32xf32> -> vector<16x32xf32>
    %167 = vector.broadcast %3 : vector<1x32xf32> to vector<16x32xf32>
    %168 = arith.addf %166, %167 : vector<16x32xf32>
    %cst_73 = arith.constant dense<0.000000e+00> : vector<32x64xf32>
    %169 = tpu.matmul %165, %1, %cst_73 {dimension_numbers = #tpu.dot_dimension_numbers<[1], [0], [0], [1], [0, 0, 1, 1], [], []>} : vector<32x32xf32>, vector<32x64xf32>, vector<32x64xf32> -> vector<32x64xf32>
    %170 = vector.broadcast %4 : vector<1x64xf32> to vector<32x64xf32>
    %171 = arith.addf %169, %170 : vector<32x64xf32>
    %172 = vector.extract_strided_slice %171 {offsets = [0, 0], sizes = [32, 32], strides = [1, 1]} : vector<32x64xf32> to vector<32x32xf32>
    %173 = vector.extract_strided_slice %171 {offsets = [0, 32], sizes = [32, 32], strides = [1, 1]} : vector<32x64xf32> to vector<32x32xf32>
    %174 = vector.extract_strided_slice %168 {offsets = [0, 0], sizes = [8, 32], strides = [1, 1]} : vector<16x32xf32> to vector<8x32xf32>
    %175 = vector.extract_strided_slice %172 {offsets = [0, 0], sizes = [16, 32], strides = [1, 1]} : vector<32x32xf32> to vector<16x32xf32>
    %176 = vector.extract_strided_slice %173 {offsets = [0, 0], sizes = [16, 32], strides = [1, 1]} : vector<32x32xf32> to vector<16x32xf32>
    %177 = vector.extract_strided_slice %174 {offsets = [0, 0], sizes = [8, 8], strides = [1, 1]} : vector<8x32xf32> to vector<8x8xf32>
    %178 = vector.extract_strided_slice %175 {offsets = [0, 0], sizes = [16, 8], strides = [1, 1]} : vector<16x32xf32> to vector<16x8xf32>
    %cst_74 = arith.constant dense<0.000000e+00> : vector<8x16xf32>
    %179 = tpu.matmul %177, %178, %cst_74 {dimension_numbers = #tpu.dot_dimension_numbers<[1], [1], [0], [0], [0, 0, 1, 0], [], []>} : vector<8x8xf32>, vector<16x8xf32>, vector<8x16xf32> -> vector<8x16xf32>
    %180 = vector.extract_strided_slice %174 {offsets = [0, 8], sizes = [8, 8], strides = [1, 1]} : vector<8x32xf32> to vector<8x8xf32>
    %181 = vector.extract_strided_slice %175 {offsets = [0, 8], sizes = [16, 8], strides = [1, 1]} : vector<16x32xf32> to vector<16x8xf32>
    %cst_75 = arith.constant dense<0.000000e+00> : vector<8x16xf32>
    %182 = tpu.matmul %180, %181, %cst_75 {dimension_numbers = #tpu.dot_dimension_numbers<[1], [1], [0], [0], [0, 0, 1, 0], [], []>} : vector<8x8xf32>, vector<16x8xf32>, vector<8x16xf32> -> vector<8x16xf32>
    %183 = vector.extract_strided_slice %174 {offsets = [0, 16], sizes = [8, 8], strides = [1, 1]} : vector<8x32xf32> to vector<8x8xf32>
    %184 = vector.extract_strided_slice %175 {offsets = [0, 16], sizes = [16, 8], strides = [1, 1]} : vector<16x32xf32> to vector<16x8xf32>
    %cst_76 = arith.constant dense<0.000000e+00> : vector<8x16xf32>
    %185 = tpu.matmul %183, %184, %cst_76 {dimension_numbers = #tpu.dot_dimension_numbers<[1], [1], [0], [0], [0, 0, 1, 0], [], []>} : vector<8x8xf32>, vector<16x8xf32>, vector<8x16xf32> -> vector<8x16xf32>
    %186 = vector.extract_strided_slice %174 {offsets = [0, 24], sizes = [8, 8], strides = [1, 1]} : vector<8x32xf32> to vector<8x8xf32>
    %187 = vector.extract_strided_slice %175 {offsets = [0, 24], sizes = [16, 8], strides = [1, 1]} : vector<16x32xf32> to vector<16x8xf32>
    %cst_77 = arith.constant dense<0.000000e+00> : vector<8x16xf32>
    %188 = tpu.matmul %186, %187, %cst_77 {dimension_numbers = #tpu.dot_dimension_numbers<[1], [1], [0], [0], [0, 0, 1, 0], [], []>} : vector<8x8xf32>, vector<16x8xf32>, vector<8x16xf32> -> vector<8x16xf32>
    %189 = tpu.concatenate %179, %182, %185, %188 in 0 : vector<8x16xf32>, vector<8x16xf32>, vector<8x16xf32>, vector<8x16xf32> -> vector<32x16xf32>
    %c0_78 = arith.constant 0 : index
    %c0_79 = arith.constant 0 : index
    %c0_80 = arith.constant 0 : index
    %190 = vector.load %arg5[%c0_78, %c0_79, %c0_80] : memref<2x1x16xf32, #tpu.memory_space<vmem>>, vector<1x1x16xf32>
    %191 = vector.shape_cast %190 : vector<1x1x16xf32> to vector<1x16xf32>
    %192 = vector.broadcast %191 : vector<1x16xf32> to vector<32x16xf32>
    %193 = arith.addf %189, %192 : vector<32x16xf32>
    %cst_81 = arith.constant dense<0xFF800000> : vector<32xf32>
    %194 = vector.multi_reduction <maximumf>, %193, %cst_81 [1] : vector<32x16xf32> to vector<32xf32>
    %195 = vector.shape_cast %194 : vector<32xf32> to vector<32x1xf32>
    %196 = vector.broadcast %195 : vector<32x1xf32> to vector<32x16xf32>
    %197 = arith.subf %193, %196 : vector<32x16xf32>
    %198 = math.exp %197 : vector<32x16xf32>
    %cst_82 = arith.constant dense<0.000000e+00> : vector<32xf32>
    %199 = vector.multi_reduction <add>, %198, %cst_82 [1] : vector<32x16xf32> to vector<32xf32>
    %200 = vector.shape_cast %199 : vector<32xf32> to vector<32x1xf32>
    %201 = tpu.reciprocal %200 {approx = true} : vector<32x1xf32> -> vector<32x1xf32>
    %202 = arith.mulf %200, %201 : vector<32x1xf32>
    %cst_83 = arith.constant 2.000000e+00 : f32
    %203 = vector.broadcast %cst_83 : f32 to vector<32x1xf32>
    %204 = arith.subf %203, %202 : vector<32x1xf32>
    %205 = arith.mulf %201, %204 : vector<32x1xf32>
    %206 = vector.extract_strided_slice %198 {offsets = [0, 0], sizes = [8, 16], strides = [1, 1]} : vector<32x16xf32> to vector<8x16xf32>
    %207 = vector.extract_strided_slice %176 {offsets = [0, 0], sizes = [16, 8], strides = [1, 1]} : vector<16x32xf32> to vector<16x8xf32>
    %cst_84 = arith.constant dense<0.000000e+00> : vector<8x8xf32>
    %208 = tpu.matmul %206, %207, %cst_84 {dimension_numbers = #tpu.dot_dimension_numbers<[1], [0], [0], [1], [0, 0, 1, 1], [], []>} : vector<8x16xf32>, vector<16x8xf32>, vector<8x8xf32> -> vector<8x8xf32>
    %209 = vector.extract_strided_slice %205 {offsets = [0, 0], sizes = [8, 1], strides = [1, 1]} : vector<32x1xf32> to vector<8x1xf32>
    %210 = vector.broadcast %209 : vector<8x1xf32> to vector<8x8xf32>
    %211 = arith.mulf %208, %210 : vector<8x8xf32>
    %c0_85 = arith.constant 0 : index
    %c0_86 = arith.constant 0 : index
    %212 = vector.load %arg15[%c0_85, %c0_86] : memref<16x32xf32, #tpu.memory_space<vmem>>, vector<8x8xf32>
    tpu.vector_store %arg15[%c0_85, %c0_86], %211 {strides = array<i32>} : memref<16x32xf32, #tpu.memory_space<vmem>>, vector<8x8xf32>,
    %213 = vector.extract_strided_slice %198 {offsets = [8, 0], sizes = [8, 16], strides = [1, 1]} : vector<32x16xf32> to vector<8x16xf32>
    %214 = vector.extract_strided_slice %176 {offsets = [0, 8], sizes = [16, 8], strides = [1, 1]} : vector<16x32xf32> to vector<16x8xf32>
    %cst_87 = arith.constant dense<0.000000e+00> : vector<8x8xf32>
    %215 = tpu.matmul %213, %214, %cst_87 {dimension_numbers = #tpu.dot_dimension_numbers<[1], [0], [0], [1], [0, 0, 1, 1], [], []>} : vector<8x16xf32>, vector<16x8xf32>, vector<8x8xf32> -> vector<8x8xf32>
    %216 = vector.extract_strided_slice %205 {offsets = [8, 0], sizes = [8, 1], strides = [1, 1]} : vector<32x1xf32> to vector<8x1xf32>
    %217 = vector.broadcast %216 : vector<8x1xf32> to vector<8x8xf32>
    %218 = arith.mulf %215, %217 : vector<8x8xf32>
    %c0_88 = arith.constant 0 : index
    %c8_89 = arith.constant 8 : index
    %219 = vector.load %arg15[%c0_88, %c8_89] : memref<16x32xf32, #tpu.memory_space<vmem>>, vector<8x8xf32>
    tpu.vector_store %arg15[%c0_88, %c8_89], %218 {strides = array<i32>} : memref<16x32xf32, #tpu.memory_space<vmem>>, vector<8x8xf32>,
    %220 = vector.extract_strided_slice %198 {offsets = [16, 0], sizes = [8, 16], strides = [1, 1]} : vector<32x16xf32> to vector<8x16xf32>
    %221 = vector.extract_strided_slice %176 {offsets = [0, 16], sizes = [16, 8], strides = [1, 1]} : vector<16x32xf32> to vector<16x8xf32>
    %cst_90 = arith.constant dense<0.000000e+00> : vector<8x8xf32>
    %222 = tpu.matmul %220, %221, %cst_90 {dimension_numbers = #tpu.dot_dimension_numbers<[1], [0], [0], [1], [0, 0, 1, 1], [], []>} : vector<8x16xf32>, vector<16x8xf32>, vector<8x8xf32> -> vector<8x8xf32>
    %223 = vector.extract_strided_slice %205 {offsets = [16, 0], sizes = [8, 1], strides = [1, 1]} : vector<32x1xf32> to vector<8x1xf32>
    %224 = vector.broadcast %223 : vector<8x1xf32> to vector<8x8xf32>
    %225 = arith.mulf %222, %224 : vector<8x8xf32>
    %c0_91 = arith.constant 0 : index
    %c16_92 = arith.constant 16 : index
    %226 = vector.load %arg15[%c0_91, %c16_92] : memref<16x32xf32, #tpu.memory_space<vmem>>, vector<8x8xf32>
    tpu.vector_store %arg15[%c0_91, %c16_92], %225 {strides = array<i32>} : memref<16x32xf32, #tpu.memory_space<vmem>>, vector<8x8xf32>,
    %227 = vector.extract_strided_slice %198 {offsets = [24, 0], sizes = [8, 16], strides = [1, 1]} : vector<32x16xf32> to vector<8x16xf32>
    %228 = vector.extract_strided_slice %176 {offsets = [0, 24], sizes = [16, 8], strides = [1, 1]} : vector<16x32xf32> to vector<16x8xf32>
    %cst_93 = arith.constant dense<0.000000e+00> : vector<8x8xf32>
    %229 = tpu.matmul %227, %228, %cst_93 {dimension_numbers = #tpu.dot_dimension_numbers<[1], [0], [0], [1], [0, 0, 1, 1], [], []>} : vector<8x16xf32>, vector<16x8xf32>, vector<8x8xf32> -> vector<8x8xf32>
    %230 = vector.extract_strided_slice %205 {offsets = [24, 0], sizes = [8, 1], strides = [1, 1]} : vector<32x1xf32> to vector<8x1xf32>
    %231 = vector.broadcast %230 : vector<8x1xf32> to vector<8x8xf32>
    %232 = arith.mulf %229, %231 : vector<8x8xf32>
    %c0_94 = arith.constant 0 : index
    %c24_95 = arith.constant 24 : index
    %233 = vector.load %arg15[%c0_94, %c24_95] : memref<16x32xf32, #tpu.memory_space<vmem>>, vector<8x8xf32>
    tpu.vector_store %arg15[%c0_94, %c24_95], %232 {strides = array<i32>} : memref<16x32xf32, #tpu.memory_space<vmem>>, vector<8x8xf32>,
    %234 = vector.extract_strided_slice %168 {offsets = [8, 0], sizes = [8, 32], strides = [1, 1]} : vector<16x32xf32> to vector<8x32xf32>
    %235 = vector.extract_strided_slice %172 {offsets = [16, 0], sizes = [16, 32], strides = [1, 1]} : vector<32x32xf32> to vector<16x32xf32>
    %236 = vector.extract_strided_slice %173 {offsets = [16, 0], sizes = [16, 32], strides = [1, 1]} : vector<32x32xf32> to vector<16x32xf32>
    %237 = vector.extract_strided_slice %234 {offsets = [0, 0], sizes = [8, 8], strides = [1, 1]} : vector<8x32xf32> to vector<8x8xf32>
    %238 = vector.extract_strided_slice %235 {offsets = [0, 0], sizes = [16, 8], strides = [1, 1]} : vector<16x32xf32> to vector<16x8xf32>
    %cst_96 = arith.constant dense<0.000000e+00> : vector<8x16xf32>
    %239 = tpu.matmul %237, %238, %cst_96 {dimension_numbers = #tpu.dot_dimension_numbers<[1], [1], [0], [0], [0, 0, 1, 0], [], []>} : vector<8x8xf32>, vector<16x8xf32>, vector<8x16xf32> -> vector<8x16xf32>
    %240 = vector.extract_strided_slice %234 {offsets = [0, 8], sizes = [8, 8], strides = [1, 1]} : vector<8x32xf32> to vector<8x8xf32>
    %241 = vector.extract_strided_slice %235 {offsets = [0, 8], sizes = [16, 8], strides = [1, 1]} : vector<16x32xf32> to vector<16x8xf32>
    %cst_97 = arith.constant dense<0.000000e+00> : vector<8x16xf32>
    %242 = tpu.matmul %240, %241, %cst_97 {dimension_numbers = #tpu.dot_dimension_numbers<[1], [1], [0], [0], [0, 0, 1, 0], [], []>} : vector<8x8xf32>, vector<16x8xf32>, vector<8x16xf32> -> vector<8x16xf32>
    %243 = vector.extract_strided_slice %234 {offsets = [0, 16], sizes = [8, 8], strides = [1, 1]} : vector<8x32xf32> to vector<8x8xf32>
    %244 = vector.extract_strided_slice %235 {offsets = [0, 16], sizes = [16, 8], strides = [1, 1]} : vector<16x32xf32> to vector<16x8xf32>
    %cst_98 = arith.constant dense<0.000000e+00> : vector<8x16xf32>
    %245 = tpu.matmul %243, %244, %cst_98 {dimension_numbers = #tpu.dot_dimension_numbers<[1], [1], [0], [0], [0, 0, 1, 0], [], []>} : vector<8x8xf32>, vector<16x8xf32>, vector<8x16xf32> -> vector<8x16xf32>
    %246 = vector.extract_strided_slice %234 {offsets = [0, 24], sizes = [8, 8], strides = [1, 1]} : vector<8x32xf32> to vector<8x8xf32>
    %247 = vector.extract_strided_slice %235 {offsets = [0, 24], sizes = [16, 8], strides = [1, 1]} : vector<16x32xf32> to vector<16x8xf32>
    %cst_99 = arith.constant dense<0.000000e+00> : vector<8x16xf32>
    %248 = tpu.matmul %246, %247, %cst_99 {dimension_numbers = #tpu.dot_dimension_numbers<[1], [1], [0], [0], [0, 0, 1, 0], [], []>} : vector<8x8xf32>, vector<16x8xf32>, vector<8x16xf32> -> vector<8x16xf32>
    %249 = tpu.concatenate %239, %242, %245, %248 in 0 : vector<8x16xf32>, vector<8x16xf32>, vector<8x16xf32>, vector<8x16xf32> -> vector<32x16xf32>
    %c1_100 = arith.constant 1 : index
    %c0_101 = arith.constant 0 : index
    %c0_102 = arith.constant 0 : index
    %250 = vector.load %arg5[%c1_100, %c0_101, %c0_102] : memref<2x1x16xf32, #tpu.memory_space<vmem>>, vector<1x1x16xf32>
    %251 = vector.shape_cast %250 : vector<1x1x16xf32> to vector<1x16xf32>
    %252 = vector.broadcast %251 : vector<1x16xf32> to vector<32x16xf32>
    %253 = arith.addf %249, %252 : vector<32x16xf32>
    %cst_103 = arith.constant dense<0xFF800000> : vector<32xf32>
    %254 = vector.multi_reduction <maximumf>, %253, %cst_103 [1] : vector<32x16xf32> to vector<32xf32>
    %255 = vector.shape_cast %254 : vector<32xf32> to vector<32x1xf32>
    %256 = vector.broadcast %255 : vector<32x1xf32> to vector<32x16xf32>
    %257 = arith.subf %253, %256 : vector<32x16xf32>
    %258 = math.exp %257 : vector<32x16xf32>
    %cst_104 = arith.constant dense<0.000000e+00> : vector<32xf32>
    %259 = vector.multi_reduction <add>, %258, %cst_104 [1] : vector<32x16xf32> to vector<32xf32>
    %260 = vector.shape_cast %259 : vector<32xf32> to vector<32x1xf32>
    %261 = tpu.reciprocal %260 {approx = true} : vector<32x1xf32> -> vector<32x1xf32>
    %262 = arith.mulf %260, %261 : vector<32x1xf32>
    %cst_105 = arith.constant 2.000000e+00 : f32
    %263 = vector.broadcast %cst_105 : f32 to vector<32x1xf32>
    %264 = arith.subf %263, %262 : vector<32x1xf32>
    %265 = arith.mulf %261, %264 : vector<32x1xf32>
    %266 = vector.extract_strided_slice %258 {offsets = [0, 0], sizes = [8, 16], strides = [1, 1]} : vector<32x16xf32> to vector<8x16xf32>
    %267 = vector.extract_strided_slice %236 {offsets = [0, 0], sizes = [16, 8], strides = [1, 1]} : vector<16x32xf32> to vector<16x8xf32>
    %cst_106 = arith.constant dense<0.000000e+00> : vector<8x8xf32>
    %268 = tpu.matmul %266, %267, %cst_106 {dimension_numbers = #tpu.dot_dimension_numbers<[1], [0], [0], [1], [0, 0, 1, 1], [], []>} : vector<8x16xf32>, vector<16x8xf32>, vector<8x8xf32> -> vector<8x8xf32>
    %269 = vector.extract_strided_slice %265 {offsets = [0, 0], sizes = [8, 1], strides = [1, 1]} : vector<32x1xf32> to vector<8x1xf32>
    %270 = vector.broadcast %269 : vector<8x1xf32> to vector<8x8xf32>
    %271 = arith.mulf %268, %270 : vector<8x8xf32>
    %c8_107 = arith.constant 8 : index
    %c0_108 = arith.constant 0 : index
    %272 = vector.load %arg15[%c8_107, %c0_108] : memref<16x32xf32, #tpu.memory_space<vmem>>, vector<8x8xf32>
    tpu.vector_store %arg15[%c8_107, %c0_108], %271 {strides = array<i32>} : memref<16x32xf32, #tpu.memory_space<vmem>>, vector<8x8xf32>,
    %273 = vector.extract_strided_slice %258 {offsets = [8, 0], sizes = [8, 16], strides = [1, 1]} : vector<32x16xf32> to vector<8x16xf32>
    %274 = vector.extract_strided_slice %236 {offsets = [0, 8], sizes = [16, 8], strides = [1, 1]} : vector<16x32xf32> to vector<16x8xf32>
    %cst_109 = arith.constant dense<0.000000e+00> : vector<8x8xf32>
    %275 = tpu.matmul %273, %274, %cst_109 {dimension_numbers = #tpu.dot_dimension_numbers<[1], [0], [0], [1], [0, 0, 1, 1], [], []>} : vector<8x16xf32>, vector<16x8xf32>, vector<8x8xf32> -> vector<8x8xf32>
    %276 = vector.extract_strided_slice %265 {offsets = [8, 0], sizes = [8, 1], strides = [1, 1]} : vector<32x1xf32> to vector<8x1xf32>
    %277 = vector.broadcast %276 : vector<8x1xf32> to vector<8x8xf32>
    %278 = arith.mulf %275, %277 : vector<8x8xf32>
    %c8_110 = arith.constant 8 : index
    %c8_111 = arith.constant 8 : index
    %279 = vector.load %arg15[%c8_110, %c8_111] : memref<16x32xf32, #tpu.memory_space<vmem>>, vector<8x8xf32>
    tpu.vector_store %arg15[%c8_110, %c8_111], %278 {strides = array<i32>} : memref<16x32xf32, #tpu.memory_space<vmem>>, vector<8x8xf32>,
    %280 = vector.extract_strided_slice %258 {offsets = [16, 0], sizes = [8, 16], strides = [1, 1]} : vector<32x16xf32> to vector<8x16xf32>
    %281 = vector.extract_strided_slice %236 {offsets = [0, 16], sizes = [16, 8], strides = [1, 1]} : vector<16x32xf32> to vector<16x8xf32>
    %cst_112 = arith.constant dense<0.000000e+00> : vector<8x8xf32>
    %282 = tpu.matmul %280, %281, %cst_112 {dimension_numbers = #tpu.dot_dimension_numbers<[1], [0], [0], [1], [0, 0, 1, 1], [], []>} : vector<8x16xf32>, vector<16x8xf32>, vector<8x8xf32> -> vector<8x8xf32>
    %283 = vector.extract_strided_slice %265 {offsets = [16, 0], sizes = [8, 1], strides = [1, 1]} : vector<32x1xf32> to vector<8x1xf32>
    %284 = vector.broadcast %283 : vector<8x1xf32> to vector<8x8xf32>
    %285 = arith.mulf %282, %284 : vector<8x8xf32>
    %c8_113 = arith.constant 8 : index
    %c16_114 = arith.constant 16 : index
    %286 = vector.load %arg15[%c8_113, %c16_114] : memref<16x32xf32, #tpu.memory_space<vmem>>, vector<8x8xf32>
    tpu.vector_store %arg15[%c8_113, %c16_114], %285 {strides = array<i32>} : memref<16x32xf32, #tpu.memory_space<vmem>>, vector<8x8xf32>,
    %287 = vector.extract_strided_slice %258 {offsets = [24, 0], sizes = [8, 16], strides = [1, 1]} : vector<32x16xf32> to vector<8x16xf32>
    %288 = vector.extract_strided_slice %236 {offsets = [0, 24], sizes = [16, 8], strides = [1, 1]} : vector<16x32xf32> to vector<16x8xf32>
    %cst_115 = arith.constant dense<0.000000e+00> : vector<8x8xf32>
    %289 = tpu.matmul %287, %288, %cst_115 {dimension_numbers = #tpu.dot_dimension_numbers<[1], [0], [0], [1], [0, 0, 1, 1], [], []>} : vector<8x16xf32>, vector<16x8xf32>, vector<8x8xf32> -> vector<8x8xf32>
    %290 = vector.extract_strided_slice %265 {offsets = [24, 0], sizes = [8, 1], strides = [1, 1]} : vector<32x1xf32> to vector<8x1xf32>
    %291 = vector.broadcast %290 : vector<8x1xf32> to vector<8x8xf32>
    %292 = arith.mulf %289, %291 : vector<8x8xf32>
    %c8_116 = arith.constant 8 : index
    %c24_117 = arith.constant 24 : index
    %293 = vector.load %arg15[%c8_116, %c24_117] : memref<16x32xf32, #tpu.memory_space<vmem>>, vector<8x8xf32>
    tpu.vector_store %arg15[%c8_116, %c24_117], %292 {strides = array<i32>} : memref<16x32xf32, #tpu.memory_space<vmem>>, vector<8x8xf32>,
    %c0_118 = arith.constant 0 : index
    %c0_119 = arith.constant 0 : index
    %294 = vector.load %arg15[%c0_118, %c0_119] : memref<16x32xf32, #tpu.memory_space<vmem>>, vector<16x32xf32>
    %cst_120 = arith.constant dense<0.000000e+00> : vector<16x32xf32>
    %295 = tpu.matmul %294, %2, %cst_120 {dimension_numbers = #tpu.dot_dimension_numbers<[1], [0], [0], [1], [0, 0, 1, 1], [], []>} : vector<16x32xf32>, vector<32x32xf32>, vector<16x32xf32> -> vector<16x32xf32>
    %296 = vector.broadcast %5 : vector<1x32xf32> to vector<16x32xf32>
    %297 = arith.addf %295, %296 : vector<16x32xf32>
    %298 = arith.addf %6, %297 : vector<16x32xf32>
    %cst_121 = arith.constant dense<0.000000e+00> : vector<16xf32>
    %299 = vector.multi_reduction <add>, %298, %cst_121 [1] : vector<16x32xf32> to vector<16xf32>
    %300 = vector.shape_cast %299 : vector<16xf32> to vector<16x1xf32>
    %cst_122 = arith.constant 3.200000e+01 : f32
    %301 = vector.broadcast %cst_122 : f32 to vector<16x1xf32>
    %302 = arith.divf %300, %301 : vector<16x1xf32>
    %303 = vector.broadcast %302 : vector<16x1xf32> to vector<16x32xf32>
    %304 = arith.subf %298, %303 : vector<16x32xf32>
    %305 = arith.mulf %304, %304 : vector<16x32xf32>
    %cst_123 = arith.constant dense<0.000000e+00> : vector<16xf32>
    %306 = vector.multi_reduction <add>, %305, %cst_123 [1] : vector<16x32xf32> to vector<16xf32>
    %307 = vector.shape_cast %306 : vector<16xf32> to vector<16x1xf32>
    %cst_124 = arith.constant 3.200000e+01 : f32
    %308 = vector.broadcast %cst_124 : f32 to vector<16x1xf32>
    %309 = arith.divf %307, %308 : vector<16x1xf32>
    %cst_125 = arith.constant 9.99999997E-7 : f32
    %310 = vector.broadcast %cst_125 : f32 to vector<16x1xf32>
    %311 = arith.addf %309, %310 : vector<16x1xf32>
    %312 = math.rsqrt %311 : vector<16x1xf32>
    %313 = vector.broadcast %312 : vector<16x1xf32> to vector<16x32xf32>
    %314 = arith.mulf %304, %313 : vector<16x32xf32>
    %c1_126 = arith.constant 1 : index
    %c0_127 = arith.constant 0 : index
    %c0_128 = arith.constant 0 : index
    %315 = vector.load %arg12[%c1_126, %c0_127, %c0_128] : memref<2x1x32xf32, #tpu.memory_space<vmem>>, vector<1x1x32xf32>
    %316 = vector.shape_cast %315 : vector<1x1x32xf32> to vector<1x32xf32>
    %317 = vector.broadcast %316 : vector<1x32xf32> to vector<16x32xf32>
    %318 = arith.mulf %314, %317 : vector<16x32xf32>
    %c1_129 = arith.constant 1 : index
    %c0_130 = arith.constant 0 : index
    %c0_131 = arith.constant 0 : index
    %319 = vector.load %arg13[%c1_129, %c0_130, %c0_131] : memref<2x1x32xf32, #tpu.memory_space<vmem>>, vector<1x1x32xf32>
    %320 = vector.shape_cast %319 : vector<1x1x32xf32> to vector<1x32xf32>
    %321 = vector.broadcast %320 : vector<1x32xf32> to vector<16x32xf32>
    %322 = arith.addf %318, %321 : vector<16x32xf32>
    %c0_132 = arith.constant 0 : index
    %c0_133 = arith.constant 0 : index
    %323 = vector.load %arg14[%c0_132, %c0_133] : memref<16x32xf32, #tpu.memory_space<vmem>>, vector<16x32xf32>
    tpu.vector_store %arg14[%c0_132, %c0_133], %322 {strides = array<i32>} : memref<16x32xf32, #tpu.memory_space<vmem>>, vector<16x32xf32>,
    return
  }
  func.func @transform_0(%arg0: i32) -> (i32, i32) {
    %c0_i32 = arith.constant 0 : i32
    %c0_i32_0 = arith.constant 0 : i32
    %c0_i32_1 = arith.constant 0 : i32
    return %c0_i32, %c0_i32_0 : i32, i32
  }
  func.func @transform_1(%arg0: i32) -> (i32, i32) {
    %c0_i32 = arith.constant 0 : i32
    %c0_i32_0 = arith.constant 0 : i32
    %c0_i32_1 = arith.constant 0 : i32
    return %c0_i32, %c0_i32_0 : i32, i32
  }
  func.func @transform_2(%arg0: i32) -> (i32, i32) {
    %c0_i32 = arith.constant 0 : i32
    %c0_i32_0 = arith.constant 0 : i32
    %c0_i32_1 = arith.constant 0 : i32
    return %c0_i32, %c0_i32_0 : i32, i32
  }
  func.func @transform_3(%arg0: i32) -> (i32, i32, i32) {
    %c0_i32 = arith.constant 0 : i32
    %c0_i32_0 = arith.constant 0 : i32
    %c0_i32_1 = arith.constant 0 : i32
    %c0_i32_2 = arith.constant 0 : i32
    return %c0_i32, %c0_i32_0, %c0_i32_1 : i32, i32, i32
  }
  func.func @transform_4(%arg0: i32) -> (i32, i32, i32) {
    %c0_i32 = arith.constant 0 : i32
    %c0_i32_0 = arith.constant 0 : i32
    %c0_i32_1 = arith.constant 0 : i32
    %c0_i32_2 = arith.constant 0 : i32
    return %c0_i32, %c0_i32_0, %c0_i32_1 : i32, i32, i32
  }
  func.func @transform_5(%arg0: i32) -> (i32, i32) {
    %c0_i32 = arith.constant 0 : i32
    %c0_i32_0 = arith.constant 0 : i32
    %c0_i32_1 = arith.constant 0 : i32
    return %c0_i32, %c0_i32_0 : i32, i32
  }
  func.func @transform_6(%arg0: i32) -> (i32, i32) {
    %c0_i32 = arith.constant 0 : i32
    %c0_i32_0 = arith.constant 0 : i32
    %c0_i32_1 = arith.constant 0 : i32
    return %c0_i32, %c0_i32_0 : i32, i32
  }
  func.func @transform_7(%arg0: i32) -> (i32, i32) {
    %c0_i32 = arith.constant 0 : i32
    %c0_i32_0 = arith.constant 0 : i32
    %c0_i32_1 = arith.constant 0 : i32
    return %c0_i32, %c0_i32_0 : i32, i32
  }
  func.func @transform_8(%arg0: i32) -> (i32, i32) {
    %c0_i32 = arith.constant 0 : i32
    %c0_i32_0 = arith.constant 0 : i32
    %c0_i32_1 = arith.constant 0 : i32
    return %c0_i32, %c0_i32_0 : i32, i32
  }
  func.func @transform_9(%arg0: i32) -> (i32, i32) {
    %c0_i32 = arith.constant 0 : i32
    %c0_i32_0 = arith.constant 0 : i32
    %c0_i32_1 = arith.constant 0 : i32
    return %c0_i32, %c0_i32_0 : i32, i32
  }
  func.func @transform_10(%arg0: i32) -> (i32, i32) {
    %c0_i32 = arith.constant 0 : i32
    %c0_i32_0 = arith.constant 0 : i32
    %c0_i32_1 = arith.constant 0 : i32
    return %c0_i32, %c0_i32_0 : i32, i32
  }
  func.func @transform_11(%arg0: i32) -> (i32, i32, i32) {
    %c0_i32 = arith.constant 0 : i32
    %c0_i32_0 = arith.constant 0 : i32
    %c0_i32_1 = arith.constant 0 : i32
    %c0_i32_2 = arith.constant 0 : i32
    return %c0_i32, %c0_i32_0, %c0_i32_1 : i32, i32, i32
  }
  func.func @transform_12(%arg0: i32) -> (i32, i32, i32) {
    %c0_i32 = arith.constant 0 : i32
    %c0_i32_0 = arith.constant 0 : i32
    %c0_i32_1 = arith.constant 0 : i32
    %c0_i32_2 = arith.constant 0 : i32
    return %c0_i32, %c0_i32_0, %c0_i32_1 : i32, i32, i32
  }
  func.func @transform_13(%arg0: i32) -> (i32, i32) {
    %c0_i32 = arith.constant 0 : i32
    %c0_i32_0 = arith.constant 0 : i32
    %c0_i32_1 = arith.constant 0 : i32
    return %c0_i32, %c0_i32_0 : i32, i32
  }
}

</mosaic_0001>

<bundles_post_ra>
// kernel: tpu_custom_call.1
= control target key start
LH: loop header
LB: loop body
LE: loop exit
PB: predicated region body
PF: predicated region fallthrough
CT: control target
= control target key end

     0   :  { %18 = vsyncpa [#allocation4], 0  ;;  %s5324_s0 = inlined_call_operand.hbm [shape: f32[16,32], index: 0, kind: input, shape index: {}]   ;;  %s5325_s1 = inlined_call_operand.hbm [shape: f32[16,32], index: 1, kind: input, shape index: {}]   ;;  %s5326_s2 = inlined_call_operand.hbm [shape: f32[32,32], index: 2, kind: input, shape index: {}]   ;;  %s5327_s3 = inlined_call_operand.vmem [shape: f32[2,1,8], index: 3, kind: input, shape index: {}]   ;;  %s5328_s4 = inlined_call_operand.hbm [shape: f32[2,1,16], index: 4, kind: input, shape index: {}]   ;;  %s5329_s5 = inlined_call_operand.hbm [shape: f32[32,32], index: 5, kind: input, shape index: {}]   ;;  %s5330_s6 = inlined_call_operand.hbm [shape: f32[1,32], index: 6, kind: input, shape index: {}]   ;;  %s5331_s7 = inlined_call_operand.hbm [shape: f32[32,64], index: 7, kind: input, shape index: {}]   ;;  %s5332_s8 = inlined_call_operand.hbm [shape: f32[1,64], index: 8, kind: input, shape index: {}]   ;;  %s5333_s9 = inlined_call_operand.vmem [shape: f32[32,32], index: 9, kind: input, shape index: {}]   ;;  %s5334_s10 = inlined_call_operand.vmem [shape: f32[1,32], index: 10, kind: input, shape index: {}]   ;;  %s5335_s11 = inlined_call_operand.vmem [shape: f32[2,1,32], index: 11, kind: input, shape index: {}]   ;;  %s5336_s12 = inlined_call_operand.vmem [shape: f32[2,1,32], index: 12, kind: input, shape index: {}]   ;;  %s5337_s13 = inlined_call_operand.hbm [shape: f32[16,32], index: 13, kind: output, shape index: {}]  }
   0x1   :  { %19 = vsyncpa [#allocation7], 0 }
   0x2   :  { %20 = vsyncpa [#allocation10], 0 }
   0x3   :  { %21 = vsyncpa [#allocation13], 0 }
   0x4   :  { %22 = vsyncpa [#allocation16], 0 }
   0x5   :  { %23 = vsyncpa [#allocation5], 0  ;;  %s4610_s25 = smov [#allocation6]   ;;  %s4611_s27 = smov [#allocation9]  }
   0x6   :  { %s41_s26 = sshll.u32 %s4610_s25, 4  ;;  %s67_s28 = sshll.u32 %s4611_s27, 4  ;;  %s42_s26 = int_to_ptr.vmem [resolvable:$true] %s41_s26  ;;  %s4704_s28 = int_to_ptr.vmem [resolvable:$true] %s67_s28 }
   0x7   :  { %s4400_s14 = scalar_lea.hbm %s5325_s1, 256 }
   0x8   :  { %p4401_p0 = scmp.ne.s32.totalorder %s5325_s1, %s4400_s14  ;;  %p4404_p1 = scmp.lt.u32.totalorder %s4400_s14, %s5325_s1 }
   0xa   :  { %p4406_p2 = pnand %p4404_p1, %p4401_p0 }
   0xc   :  { %4409 = shalt.err (!%p4406_p2)
}
   0xd   :  { %s4410_s19 = scalar_lea.vmem %s42_s26, 256  ;;  %p4415_p4 = scmp.lt.s32.totalorder %s42_s26, %s42_s26 }
   0xe   :  { %p4411_p3 = scmp.ne.s32.totalorder %s42_s26, %s4410_s19  ;;  %p4416_p5 = scmp.lt.s32.totalorder %s4410_s19, %s4410_s19 }
  0x10   :  { %p4417_p6 = por %p4416_p5, %p4415_p4 }
  0x12   :  { %p4418_p7 = pnand %p4417_p6, %p4411_p3 }
  0x14   :  { %4421 = shalt.err (!%p4418_p7)
}
  0x15   :  { %s4612_s20 = smov 128   ;;  %s4613_s21 = smov 8  }
  0x16   :  { %47 = dma.hbm_to_vmem [thread:$0]  %s5325_s1, 256, %s42_s26, [#allocation7], %s4612_s20, %s4612_s20, %s4613_s21  }
  0x17   :  { %s4422_s27 = scalar_lea.hbm %s5328_s4, 32 }
  0x18   :  { %p4423_p8 = scmp.ne.s32.totalorder %s5328_s4, %s4422_s27  ;;  %p4426_p9 = scmp.lt.u32.totalorder %s4422_s27, %s5328_s4 }
  0x1a   :  { %p4428_p10 = pnand %p4426_p9, %p4423_p8 }
  0x1c   :  { %4431 = shalt.err (!%p4428_p10)
}
  0x1d   :  { %s4432_s16 = scalar_lea.vmem %s4704_s28, 32  ;;  %p4437_p12 = scmp.lt.s32.totalorder %s4704_s28, %s4704_s28 }
  0x1e   :  { %p4433_p11 = scmp.ne.s32.totalorder %s4704_s28, %s4432_s16  ;;  %p4438_p13 = scmp.lt.s32.totalorder %s4432_s16, %s4432_s16 }
  0x20   :  { %p4439_p0 = por %p4438_p13, %p4437_p12 }
  0x22   :  { %p4440_p1 = pnand %p4439_p0, %p4433_p11 }
  0x24   :  { %4443 = shalt.err (!%p4440_p1)
}
  0x25   :  { %s4614_s1 = smov 16   ;;  %s4615_s26 = smov 1  }
  0x26   :  { %73 = dma.hbm_to_vmem [thread:$0]  %s5328_s4, 32, %s4704_s28, [#allocation10], %s4614_s1, %s4614_s1, %s4615_s26  }
  0x27   :  { %s4616_s19 = smov [#allocation12]   ;;  %s4617_s23 = smov [#allocation3]  }
  0x28   :  { %s92_s22 = sshll.u32 %s4616_s19, 4  ;;  %s29_s24 = sshll.u32 %s4617_s23, 4  ;;  %s93_s22 = int_to_ptr.vmem [resolvable:$true] %s92_s22  ;;  %s4740_s24 = int_to_ptr.vmem [resolvable:$true] %s29_s24 }
  0x29   :  { %s4444_s29 = scalar_lea.hbm %s5330_s6, 16 }
  0x2a   :  { %p4445_p2 = scmp.ne.s32.totalorder %s5330_s6, %s4444_s29  ;;  %p4448_p3 = scmp.lt.u32.totalorder %s4444_s29, %s5330_s6 }
  0x2c   :  { %p4450_p4 = pnand %p4448_p3, %p4445_p2 }
  0x2e   :  { %4453 = shalt.err (!%p4450_p4)
}
  0x2f   :  { %s4454_s4 = scalar_lea.vmem %s93_s22, 16  ;;  %s4458_s28 = scalar_lea.vmem %s93_s22, 32 }
  0x30   :  { %p4455_p5 = scmp.ne.s32.totalorder %s93_s22, %s4454_s4  ;;  %p4459_p6 = scmp.lt.s32.totalorder %s93_s22, %s93_s22 }
  0x31   :  { %p4460_p7 = scmp.lt.s32.totalorder %s4458_s28, %s4454_s4 }
  0x33   :  { %p4461_p8 = por %p4460_p7, %p4459_p6 }
  0x35   :  { %p4462_p9 = pnand %p4461_p8, %p4455_p5 }
  0x37   :  { %4465 = shalt.err (!%p4462_p9)
}
  0x38   :  { %95 = dma.hbm_to_vmem [thread:$0]  %s5330_s6, 16, %s93_s22, [#allocation13]  }
  0x39   :  { %s4466_s23 = scalar_lea.hbm %s5324_s0, 256 }
  0x3a   :  { %p4467_p10 = scmp.ne.s32.totalorder %s5324_s0, %s4466_s23  ;;  %p4470_p11 = scmp.lt.u32.totalorder %s4466_s23, %s5324_s0 }
  0x3c   :  { %p4472_p12 = pnand %p4470_p11, %p4467_p10 }
  0x3e   :  { %4475 = shalt.err (!%p4472_p12)
}
  0x3f   :  { %s4476_s14 = scalar_lea.vmem %s4740_s24, 256  ;;  %p4481_p0 = scmp.lt.s32.totalorder %s4740_s24, %s4740_s24 }
  0x40   :  { %p4477_p13 = scmp.ne.s32.totalorder %s4740_s24, %s4476_s14  ;;  %p4482_p1 = scmp.lt.s32.totalorder %s4476_s14, %s4476_s14 }
  0x42   :  { %p4483_p2 = por %p4482_p1, %p4481_p0 }
  0x44   :  { %p4484_p3 = pnand %p4483_p2, %p4477_p13 }
  0x46   :  { %4487 = shalt.err (!%p4484_p3)
}
  0x47   :  { %35 = dma.hbm_to_vmem [thread:$0]  %s5324_s0, 256, %s4740_s24, [#allocation4], %s4612_s20, %s4612_s20, %s4613_s21  }
  0x48   :  { %s4618_s15 = smov [#allocation8]   ;;  %s4619_s4 = smov [#allocation11]  }
  0x49   :  { %s53_s16 = sshll.u32 %s4618_s15, 4  ;;  %s79_s28 = sshll.u32 %s4619_s4, 4  ;;  %s54_s16 = int_to_ptr.vmem [resolvable:$true] %s53_s16  ;;  %s4774_s28 = int_to_ptr.vmem [resolvable:$true] %s79_s28 }
  0x4a   :  { %s4488_s18 = scalar_lea.hbm %s5326_s2, 512 }
  0x4b   :  { %p4489_p4 = scmp.ne.s32.totalorder %s5326_s2, %s4488_s18  ;;  %p4492_p5 = scmp.lt.u32.totalorder %s4488_s18, %s5326_s2 }
  0x4d   :  { %p4494_p6 = pnand %p4492_p5, %p4489_p4 }
  0x4f   :  { %4497 = shalt.err (!%p4494_p6)
}
  0x50   :  { %s4498_s0 = scalar_lea.vmem %s54_s16, 512  ;;  %p4503_p8 = scmp.lt.s32.totalorder %s54_s16, %s54_s16 }
  0x51   :  { %p4499_p7 = scmp.ne.s32.totalorder %s54_s16, %s4498_s0  ;;  %p4504_p9 = scmp.lt.s32.totalorder %s4498_s0, %s4498_s0 }
  0x53   :  { %p4505_p10 = por %p4504_p9, %p4503_p8 }
  0x55   :  { %p4506_p11 = pnand %p4505_p10, %p4499_p7 }
  0x57   :  { %4509 = shalt.err (!%p4506_p11)
}
  0x58   :  { %59 = dma.hbm_to_vmem [thread:$0]  %s5326_s2, 512, %s54_s16, [#allocation7], %s4612_s20, %s4612_s20, %s4613_s21  }
  0x59   :  { %s4510_s6 = scalar_lea.hbm %s5329_s5, 512 }
  0x5a   :  { %p4511_p12 = scmp.ne.s32.totalorder %s5329_s5, %s4510_s6  ;;  %p4514_p13 = scmp.lt.u32.totalorder %s4510_s6, %s5329_s5 }
  0x5c   :  { %p4516_p0 = pnand %p4514_p13, %p4511_p12 }
  0x5e   :  { %4519 = shalt.err (!%p4516_p0)
}
  0x5f   :  { %s4520_s17 = scalar_lea.vmem %s4774_s28, 512  ;;  %p4525_p2 = scmp.lt.s32.totalorder %s4774_s28, %s4774_s28 }
  0x60   :  { %p4521_p1 = scmp.ne.s32.totalorder %s4774_s28, %s4520_s17  ;;  %p4526_p3 = scmp.lt.s32.totalorder %s4520_s17, %s4520_s17 }
  0x62   :  { %p4527_p4 = por %p4526_p3, %p4525_p2 }
  0x64   :  { %p4528_p5 = pnand %p4527_p4, %p4521_p1 }
  0x66   :  { %4531 = shalt.err (!%p4528_p5)
}
  0x67   :  { %85 = dma.hbm_to_vmem [thread:$0]  %s5329_s5, 512, %s4774_s28, [#allocation10], %s4612_s20, %s4612_s20, %s4613_s21  }
  0x68   :  { %s4620_s18 = smov [#allocation14]   ;;  %s4621_s23 = smov [#allocation15]  }
  0x69   :  { %s101_s19 = sshll.u32 %s4620_s18, 4  ;;  %s114_s25 = sshll.u32 %s4621_s23, 4  ;;  %s102_s19 = int_to_ptr.vmem [resolvable:$true] %s101_s19  ;;  %s115_s25 = int_to_ptr.vmem [resolvable:$true] %s114_s25 }
  0x6a   :  { %s4532_s24 = scalar_lea.hbm %s5331_s7, 512 }
  0x6b   :  { %p4533_p6 = scmp.ne.s32.totalorder %s5331_s7, %s4532_s24  ;;  %p4536_p7 = scmp.lt.u32.totalorder %s4532_s24, %s5331_s7 }
  0x6d   :  { %p4538_p8 = pnand %p4536_p7, %p4533_p6 }
  0x6f   :  { %4541 = shalt.err (!%p4538_p8)
}
  0x70   :  { %s4542_s5 = scalar_lea.vmem %s102_s19, 512  ;;  %p4547_p10 = scmp.lt.s32.totalorder %s102_s19, %s102_s19 }
  0x71   :  { %p4543_p9 = scmp.ne.s32.totalorder %s102_s19, %s4542_s5  ;;  %p4548_p11 = scmp.lt.s32.totalorder %s4542_s5, %s4542_s5 }
  0x73   :  { %p4549_p12 = por %p4548_p11, %p4547_p10 }
  0x75   :  { %p4550_p13 = pnand %p4549_p12, %p4543_p9 }
  0x77   :  { %4553 = shalt.err (!%p4550_p13)
}
  0x78   :  { %107 = dma.hbm_to_vmem [thread:$0]  %s5331_s7, 512, %s102_s19, [#allocation13], %s4612_s20, %s4612_s20, %s4613_s21  }
  0x79   :  { %s4554_s26 = scalar_lea.hbm %s5332_s8, 16 }
  0x7a   :  { %p4555_p0 = scmp.ne.s32.totalorder %s5332_s8, %s4554_s26  ;;  %p4558_p1 = scmp.lt.u32.totalorder %s4554_s26, %s5332_s8 }
  0x7c   :  { %p4560_p2 = pnand %p4558_p1, %p4555_p0 }
  0x7e   :  { %4563 = shalt.err (!%p4560_p2)
}
  0x7f   :  { %s4564_s23 = scalar_lea.vmem %s115_s25, 16  ;;  %s4568_s27 = scalar_lea.vmem %s115_s25, 32 }
  0x80   :  { %p4565_p3 = scmp.ne.s32.totalorder %s115_s25, %s4564_s23  ;;  %p4569_p4 = scmp.lt.s32.totalorder %s115_s25, %s115_s25 }
  0x81   :  { %p4570_p5 = scmp.lt.s32.totalorder %s4568_s27, %s4564_s23 }
  0x83   :  { %p4571_p6 = por %p4570_p5, %p4569_p4 }
  0x85   :  { %p4572_p7 = pnand %p4571_p6, %p4565_p3 }
  0x87   :  { %4575 = shalt.err (!%p4572_p7)
}
  0x88   :  { %117 = dma.hbm_to_vmem [thread:$0]  %s5332_s8, 16, %s115_s25, [#allocation16]  }
  0x89   :  { %4598 = dma.done.wait [#allocation4], 256  }
  0x8a   :  { %4599 = vsyncadd [#allocation4], 4294967040 }
  0x8b   :  { %4600 = dma.done.wait [#allocation7], 768  }
  0x8c   :  { %4601 = vsyncadd [#allocation7], 4294966528 }
  0x8d   :  { %4602 = dma.done.wait [#allocation10], 544  }
  0x8e   :  { %4603 = vsyncadd [#allocation10], 4294966752 }
  0x8f   :  { %4604 = dma.done.wait [#allocation13], 528  }
  0x90   :  { %4605 = vsyncadd [#allocation13], 4294966768 }
  0x91   :  { %4606 = dma.done.wait [#allocation16], 16  }
  0x92   :  { %4607 = vsyncadd [#allocation16], 4294967280  ;;  %v154_v0 = vld [vmem:[#allocation14] sm:$0xff]  ;;  %v155_v1 = vld [vmem:[#allocation14 + $0x8] sm:$0xff]  ;;  %vm175_vm0 = vcmask 261120   ;;  %v4622_v16 = vmov 0.0  }
  0x93   :  { %v150_v2 = vld [vmem:[#allocation11] sm:$0xff]  ;;  %v4838_v3 = vpack.c.bf16 %v155_v1, %v154_v0  ;;  %v151_v4 = vld [vmem:[#allocation11 + $0x8] sm:$0xff]  ;;  %v156_v5 = vld [vmem:[#allocation14 + $0x10] sm:$0xff]  ;;  %vm4623_vm1 = vmmov 0   ;;  %vm344_vm2 = vcmask 64512   ;;  %s4624_s8 = smov 112  }
  0x94   :  { %v157_v6 = vld [vmem:[#allocation14 + $0x18] sm:$0xff]  ;;  %v4840_v7 = vpack.c.bf16 %v151_v4, %v150_v2  ;;  %v152_v9 = vld [vmem:[#allocation11 + $0x10] sm:$0xff]  ;;  %v4859_v15 = vld [vmem:[#allocation3 + $0x8] sm:$0xff]  ;;  %s4625_s25 = smov 120   ;;  %s4626_s0 = smov 104   ;;  %vm877_vm3 = vcmask 130112  }
  0x95   :  { %v4842_v8 = vpack.c.bf16 %v157_v6, %v156_v5  ;;  %v153_v10 = vld [vmem:[#allocation11 + $0x18] sm:$0xff]  ;;  %v167_v11 = vld [vmem:[#allocation6] sm:$0xff]  ;;  %4137 = vmatprep.subr.bf16.mxu1 %v4838_v3  ;;  %v4870_v17 = vld [vmem:[#allocation15] ss:$0 sm:$0xff]  ;;  %s4627_s24 = smov 96   ;;  %s4628_s29 = smov 88  }
  0x96   :  { %v4845_v12 = vpack.c.bf16 %v153_v10, %v152_v9  ;;  %3886 = vmatprep.mubr.msk.f32.mxu1 %vm175_vm0, %v167_v11  ;;  %v4848_v13 = vld [vmem:[#allocation3] sm:$0xff]  ;;  %4139 = vmatpush3.bf16.msra.mxu1 %v4838_v3  ;;  %v168_v14 = vld [vmem:[#allocation6 + $0x8] sm:$0xff]  ;;  %s4629_s30 = smov 80   ;;  %s4630_s14 = smov 72   ;;  %v3679_v33 = vld [vmem:[%s5327_s3] ss:$0 sm:$0xff] }
  0x97   :  { %4129 = vmatprep.subr.bf16.mxu0 %v4840_v7  ;;  %4141 = vmatprep.subr.bf16.mxu1 %v4842_v8  ;;  %v4876_v21 = vld [vmem:[#allocation12] ss:$0 sm:$0xff]  ;;  %vm960_vm4 = vcmask 195712   ;;  %vm1043_vm5 = vcmask 261312   ;;  %vm5099_vm6 = vmpackc.low %vm344_vm2, %vm344_vm2  ;;  %vm2397_vm7 = vcmask 130048  }
  0x98   :  { %4131 = vmatpush3.bf16.msra.mxu0 %v4840_v7  ;;  %3875 = vmatprep.mubr.msk.f32.mxu0 %vm175_vm0, %v4848_v13 }
  0x99   :  { %4133 = vmatprep.subr.bf16.mxu0 %v4845_v12 }
  0x9a   :  { %4143 = vmatpush3.bf16.msra.mxu1 %v4842_v8 }
  0x9b   :  { %3889 = vmatprep.subr.mxu1 %v4622_v16 }
  0x9c   :  { %4135 = vmatpush3.bf16.msra.mxu0 %v4845_v12 }
  0x9d   :  { %3887 = vmatmul.mubr.msk.f32.vlgmr.msra.gmra.mrb[0].mxu1 %vm175_vm0, %v168_v14  ;;  %3899 = vmatprep.subr.mxu0 %v4622_v16 }
  0x9e   :  { %3891 = vmatprep.mubr.msk.f32.mxu1 %vm4623_vm1, %v4622_v16 }
  0x9f   :  { %3876 = vmatmul.mubr.msk.f32.vlgmr.msra.gmra.mrb[0].mxu0 %vm175_vm0, %v4859_v15 }
  0xa0   :  { %3901 = vmatprep.mubr.msk.f32.mxu0 %vm4623_vm1, %v4622_v16 }
 0x170   :  { %v4872_v18 = vpop.f32.mrb[0].mxu1 }
 0x171   :  { %v335_v19 = vpop.f32.mrb[1].mxu1  ;;  %v4924_v51 = vadd.f32 %v4872_v18, %v4870_v17 }
 0x172   :  { %v4874_v20 = vpop.f32.mrb[0].mxu0  ;;  %v336_v22 = vadd.f32 %v4870_v17, %v335_v19 }
 0x173   :  { %v248_v23 = vpop.f32.mrb[1].mxu0  ;;  %v254_v50 = vadd.f32 %v4874_v20, %v4876_v21 }
 0x174   :  { %501 = vrot.lane.b32.xlu1 %v336_v22, %s4624_s8  ;;  %423 = vrot.lane.b32.xlu0 %v336_v22, %s4625_s25  ;;  %v249_v24 = vadd.f32 %v4876_v21, %v248_v23 }
 0x175   :  { %3890 = vmatpush3.xpose.msk.msra.mxu1 %vm344_vm2, %v336_v22 }
 0x176   :  { %3894 = vmatprep.subr.mxu1 %v4622_v16 }
 0x178   :  { %3892 = vmatmul.mubr.msk.f32.vlgmr.msra.gmra.mrb[2].mxu1 %vm344_vm2, %v249_v24  ;;  %579 = vrot.lane.b32.xlu1 %v336_v22, %s4626_s0 }
 0x179   :  { %421 = vrot.lane.b32.xlu0 %v249_v24, %s4625_s25  ;;  %3896 = vmatprep.mubr.msk.f32.mxu1 %vm4623_vm1, %v4622_v16 }
 0x17c   :  { %577 = vrot.lane.b32.xlu1 %v249_v24, %s4626_s0 }
 0x17d   :  { %499 = vrot.lane.b32.xlu0 %v249_v24, %s4624_s8 }
 0x180   :  { %718 = vrot.lane.b32.xlu1 %v336_v22, %s4627_s24 }
 0x181   :  { %796 = vrot.lane.b32.xlu0 %v336_v22, %s4628_s29 }
 0x184   :  { %879 = vrot.lane.b32.xlu1 %v336_v22, %s4629_s30 }
 0x188   :  { %962 = vrot.lane.b32.xlu1 %v336_v22, %s4630_s14 }
 0x1e6   :  { %v502_v25 = vpop.permute.xlu1 %501  ;;  %v424_v26 = vpop.permute.xlu0 %423 }
 0x1e7   :  { %3895 = vmatpush3.xpose.msk.msra.mxu1 %vm344_vm2, %v424_v26  ;;  %3900 = vmatpush3.xpose.msk.msra.mxu0 %vm344_vm2, %v502_v25 }
 0x1e8   :  { %3904 = vmatprep.subr.mxu1 %v4622_v16  ;;  %3909 = vmatprep.subr.mxu0 %v4622_v16 }
 0x1ea   :  { %v580_v27 = vpop.permute.xlu1 %579 }
 0x1eb   :  { %v422_v28 = vpop.permute.xlu0 %421 }
 0x1ec   :  { %3897 = vmatmul.mubr.msk.f32.vlgmr.msra.gmra.mrb[4].mxu1 %vm344_vm2, %v422_v28  ;;  %v3693_v28 = vld [vmem:[%s5327_s3 + $0x1] ss:$0 sm:$0xff]  ;;  %s4631_s3 = smov 24  }
 0x1ed   :  { %3905 = vmatpush3.xpose.msk.msra.mxu1 %vm344_vm2, %v580_v27  ;;  %3906 = vmatprep.mubr.msk.f32.mxu1 %vm4623_vm1, %v4622_v16 }
 0x1ee   :  { %v578_v29 = vpop.permute.xlu1 %577  ;;  %3914 = vmatprep.subr.mxu1 %v4622_v16 }
 0x1ef   :  { %v500_v30 = vpop.permute.xlu0 %499 }
 0x1f0   :  { %3902 = vmatmul.mubr.msk.f32.vlgmr.msra.gmra.mrb[2].mxu0 %vm344_vm2, %v500_v30  ;;  %3907 = vmatmul.mubr.msk.f32.vlgmr.msra.gmra.mrb[6].mxu1 %vm344_vm2, %v578_v29 }
 0x1f1   :  { %3911 = vmatprep.mubr.msk.f32.mxu0 %vm4623_vm1, %v4622_v16  ;;  %3916 = vmatprep.mubr.msk.f32.mxu1 %vm4623_vm1, %v4622_v16 }
 0x1f2   :  { %v719_v31 = vpop.permute.xlu1 %718 }
 0x1f3   :  { %v797_v32 = vpop.permute.xlu0 %796  ;;  %3910 = vmatpush3.msra.mxu0 %v719_v31 }
 0x1f4   :  { %3915 = vmatpush3.msra.mxu1 %v797_v32  ;;  %3919 = vmatprep.subr.mxu0 %v4622_v16 }
 0x1f5   :  { %3924 = vmatprep.subr.mxu1 %v4622_v16 }
 0x1f6   :  { %v880_v56 = vpop.permute.xlu1 %879 }
 0x1fa   :  { %v963_v57 = vpop.permute.xlu1 %962 }
 0x24b   :  { %v417_v34 = vpop.f32.mrb[2].mxu1 }
 0x24c   :  { %v662_v35 = vadd.f32 %v3679_v33, %v417_v34  ;;  %v3893_v36 = vpop.f32.mrb[3].mxu1 }
 0x24e   :  { %v666_v37 = vsel %vm344_vm2, %v662_v35, -inf }
 0x24f   :  { %667 = vmax.xlane.f32.xlu0 %v666_v37 }
 0x2bf   :  { %v495_v38 = vpop.f32.mrb[4].mxu1 }
 0x2c0   :  { %v663_v39 = vadd.f32 %v3679_v33, %v495_v38  ;;  %v3898_v40 = vpop.f32.mrb[5].mxu1 }
 0x2c2   :  { %v669_v41 = vsel %vm344_vm2, %v663_v39, -inf }
 0x2c3   :  { %v573_v42 = vpop.f32.mrb[2].mxu0  ;;  %670 = vmax.xlane.f32.xlu1 %v669_v41  ;;  %v651_v43 = vpop.f32.mrb[6].mxu1 }
 0x2c4   :  { %v664_v44 = vadd.f32 %v3679_v33, %v573_v42  ;;  %v3903_v45 = vpop.f32.mrb[3].mxu0  ;;  %v3908_v46 = vpop.f32.mrb[7].mxu1  ;;  %v665_v47 = vadd.f32 %v3679_v33, %v651_v43 }
 0x2c6   :  { %v672_v48 = vsel %vm344_vm2, %v664_v44, -inf  ;;  %v675_v49 = vsel %vm344_vm2, %v665_v47, -inf }
 0x2c7   :  { %673 = vmax.xlane.f32.xlu0 %v672_v48 }
 0x2cb   :  { %676 = vmax.xlane.f32.xlu0 %v675_v49 }
 0x2d4   :  { %1121 = vrot.lane.b32.xlu1 %v254_v50, %s4625_s25 }
 0x2d8   :  { %1279 = vrot.lane.b32.xlu1 %v4924_v51, %s4626_s0 }
 0x2dc   :  { %v668_v52 = vpop.xlane.xlu0 %667  ;;  %1277 = vrot.lane.b32.xlu1 %v254_v50, %s4626_s0 }
 0x2dd   :  { %v678_v53 = vsub.f32 %v662_v35, %v668_v52 }
 0x2df   :  { %v682_v54 = vmul.f32 1.442695, %v678_v53 }
 0x2e0   :  { %1419 = vrot.lane.b32.xlu1 %v4924_v51, %s4627_s24 }
 0x2e1   :  { %4326 = vpow2.f32 %v682_v54  ;;  %1123 = vrot.lane.b32.xlu0 %v4924_v51, %s4625_s25 }
 0x2e5   :  { %1201 = vrot.lane.b32.xlu0 %v4924_v51, %s4624_s8 }
 0x2e9   :  { %1199 = vrot.lane.b32.xlu0 %v254_v50, %s4624_s8 }
 0x2eb   :  { %v4936_v55 = vpop.eup %4326 }
 0x2ec   :  { %3912 = vmatmul.mubr.msk.f32.vlgmr.msra.gmra.mrb[4].mxu0 %vm344_vm2, %v4936_v55 }
 0x2ed   :  { %3920 = vmatpush3.msra.mxu0 %v880_v56  ;;  %3921 = vmatprep.mubr.msk.f32.mxu0 %vm4623_vm1, %v4622_v16 }
 0x2ee   :  { %3929 = vmatprep.subr.mxu0 %v4622_v16 }
 0x350   :  { %v671_v58 = vpop.xlane.xlu1 %670 }
 0x351   :  { %v679_v59 = vsub.f32 %v663_v39, %v671_v58 }
 0x353   :  { %v684_v60 = vmul.f32 1.442695, %v679_v59 }
 0x354   :  { %v674_v61 = vpop.xlane.xlu0 %673  ;;  %v1122_v2 = vpop.permute.xlu1 %1121 }
 0x355   :  { %4328 = vpow2.f32 %v684_v60  ;;  %v680_v62 = vsub.f32 %v664_v44, %v674_v61 }
 0x357   :  { %v686_v63 = vmul.f32 1.442695, %v680_v62 }
 0x358   :  { %v677_v0 = vpop.xlane.xlu0 %676  ;;  %v1280_v9 = vpop.permute.xlu1 %1279 }
 0x359   :  { %4330 = vpow2.f32 %v686_v63  ;;  %v681_v1 = vsub.f32 %v665_v47, %v677_v0 }
 0x35b   :  { %v688_v4 = vmul.f32 1.442695, %v681_v1 }
 0x35c   :  { %v1124_v6 = vpop.permute.xlu0 %1123  ;;  %v1278_v14 = vpop.permute.xlu1 %1277 }
 0x35d   :  { %4332 = vpow2.f32 %v688_v4 }
 0x35f   :  { %v4943_v5 = vpop.eup %4328 }
 0x360   :  { %3917 = vmatmul.mubr.msk.f32.vlgmr.msra.gmra.mrb[8].mxu1 %vm344_vm2, %v4943_v5  ;;  %v1202_v11 = vpop.permute.xlu0 %1201  ;;  %v1420_v20 = vpop.permute.xlu1 %1419  ;;  %v693_v48 = vsel %vm344_vm2, %v4943_v5, 0.0 }
 0x361   :  { %3925 = vmatpush3.msra.mxu1 %v963_v57  ;;  %3926 = vmatprep.mubr.msk.f32.mxu1 %vm4623_vm1, %v4622_v16 }
 0x362   :  { %3934 = vmatprep.subr.mxu1 %v4622_v16 }
 0x363   :  { %v4331_v10 = vpop.eup %4330 }
 0x364   :  { %3922 = vmatmul.mubr.msk.f32.vlgmr.msra.gmra.mrb[6].mxu0 %vm344_vm2, %v4331_v10  ;;  %v1200_v19 = vpop.permute.xlu0 %1199  ;;  %v696_v47 = vsel %vm344_vm2, %v4331_v10, 0.0 }
 0x365   :  { %3930 = vmatpush3.xpose.msk.msra.mxu0 %vm344_vm2, %v4924_v51  ;;  %3931 = vmatprep.mubr.msk.f32.mxu0 %vm4623_vm1, %v4622_v16 }
 0x366   :  { %3939 = vmatprep.subr.mxu0 %v4622_v16 }
 0x367   :  { %v4333_v18 = vpop.eup %4332 }
 0x368   :  { %3927 = vmatmul.mubr.msk.f32.vlgmr.msra.gmra.mrb[10].mxu1 %vm344_vm2, %v4333_v18  ;;  %3932 = vmatmul.mubr.msk.f32.vlgmr.msra.gmra.mrb[8].mxu0 %vm344_vm2, %v254_v50  ;;  %v699_v49 = vsel %vm344_vm2, %v4333_v18, 0.0 }
 0x369   :  { %3935 = vmatpush3.xpose.msk.msra.mxu1 %vm344_vm2, %v1124_v6  ;;  %3940 = vmatpush3.xpose.msk.msra.mxu0 %vm344_vm2, %v1202_v11  ;;  %v690_v11 = vsel %vm344_vm2, %v4936_v55, 0.0 }
 0x36a   :  { %3936 = vmatprep.mubr.msk.f32.mxu1 %vm4623_vm1, %v4622_v16  ;;  %3941 = vmatprep.mubr.msk.f32.mxu0 %vm4623_vm1, %v4622_v16 }
 0x36b   :  { %3944 = vmatprep.subr.mxu1 %v4622_v16  ;;  %3949 = vmatprep.subr.mxu0 %v4622_v16 }
 0x36c   :  { %3937 = vmatmul.mubr.msk.f32.vlgmr.msra.gmra.mrb[12].mxu1 %vm344_vm2, %v1122_v2  ;;  %3942 = vmatmul.mubr.msk.f32.vlgmr.msra.gmra.mrb[10].mxu0 %vm344_vm2, %v1200_v19 }
 0x36d   :  { %3945 = vmatpush3.xpose.msk.msra.mxu1 %vm344_vm2, %v1280_v9  ;;  %3950 = vmatpush3.msra.mxu0 %v1420_v20 }
 0x36e   :  { %3946 = vmatprep.mubr.msk.f32.mxu1 %vm4623_vm1, %v4622_v16  ;;  %3954 = vmatprep.subr.mxu1 %v4622_v16 }
 0x36f   :  { %3951 = vmatprep.mubr.msk.f32.mxu0 %vm4623_vm1, %v4622_v16  ;;  %3959 = vmatprep.subr.mxu0 %v4622_v16 }
 0x370   :  { %3947 = vmatmul.mubr.msk.f32.vlgmr.msra.gmra.mrb[14].mxu1 %vm344_vm2, %v1278_v14 }
 0x371   :  { %3956 = vmatprep.mubr.msk.f32.mxu1 %vm4623_vm1, %v4622_v16 }
 0x3bf   :  { %v4978_v22 = vpop.f32.mrb[4].mxu0 }
 0x3c0   :  { %v3913_v23 = vpop.f32.mrb[5].mxu0 }
 0x433   :  { %v4980_v24 = vpop.f32.mrb[8].mxu1 }
 0x434   :  { %v3918_v25 = vpop.f32.mrb[9].mxu1 }
 0x437   :  { %v4982_v26 = vpop.f32.mrb[6].mxu0 }
 0x438   :  { %v3923_v27 = vpop.f32.mrb[7].mxu0 }
 0x43b   :  { %v4987_v29 = vpop.f32.mrb[10].mxu1  ;;  %v1117_v30 = vpop.f32.mrb[8].mxu0 }
 0x43c   :  { %v1363_v31 = vadd.f32 %v3693_v28, %v1117_v30  ;;  %v3928_v32 = vpop.f32.mrb[11].mxu1  ;;  %v3933_v33 = vpop.f32.mrb[9].mxu0 }
 0x43e   :  { %v1367_v34 = vsel %vm344_vm2, %v1363_v31, -inf }
 0x43f   :  { %1368 = vmax.xlane.f32.xlu0 %v1367_v34  ;;  %v1195_v35 = vpop.f32.mrb[12].mxu1  ;;  %v1273_v36 = vpop.f32.mrb[10].mxu0 }
 0x440   :  { %v1364_v37 = vadd.f32 %v3693_v28, %v1195_v35  ;;  %v1365_v38 = vadd.f32 %v3693_v28, %v1273_v36  ;;  %v3938_v39 = vpop.f32.mrb[13].mxu1  ;;  %v3943_v40 = vpop.f32.mrb[11].mxu0 }
 0x442   :  { %v1373_v41 = vsel %vm344_vm2, %v1365_v38, -inf  ;;  %v1370_v42 = vsel %vm344_vm2, %v1364_v37, -inf }
 0x443   :  { %1374 = vmax.xlane.f32.xlu0 %v1373_v41  ;;  %1371 = vmax.xlane.f32.xlu1 %v1370_v42  ;;  %v1351_v43 = vpop.f32.mrb[14].mxu1 }
 0x444   :  { %v1366_v44 = vadd.f32 %v3693_v28, %v1351_v43  ;;  %v3948_v45 = vpop.f32.mrb[15].mxu1 }
 0x446   :  { %v1376_v46 = vsel %vm344_vm2, %v1366_v44, -inf }
 0x447   :  { %1377 = vmax.xlane.f32.xlu0 %v1376_v46 }
 0x454   :  { %1579 = vrot.lane.b32.xlu1 %v4924_v51, %s4629_s30 }
 0x458   :  { %1661 = vrot.lane.b32.xlu1 %v4924_v51, %s4630_s14 }
 0x45d   :  { %1497 = vrot.lane.b32.xlu0 %v4924_v51, %s4628_s29 }
 0x47c   :  { %697 = vadd.xlane.f32.xlu1 %v696_v47  ;;  %694 = vadd.xlane.f32.xlu0 %v693_v48 }
 0x480   :  { %700 = vadd.xlane.f32.xlu0 %v699_v49 }
 0x4cc   :  { %v1369_v50 = vpop.xlane.xlu0 %1368 }
 0x4cd   :  { %v1379_v52 = vsub.f32 %v1363_v31, %v1369_v50 }
 0x4cf   :  { %v1383_v53 = vmul.f32 1.442695, %v1379_v52 }
 0x4d0   :  { %v1375_v54 = vpop.xlane.xlu0 %1374  ;;  %v1372_v56 = vpop.xlane.xlu1 %1371 }
 0x4d1   :  { %4334 = vpow2.f32 %v1383_v53  ;;  %v1381_v57 = vsub.f32 %v1365_v38, %v1375_v54  ;;  %v1380_v58 = vsub.f32 %v1364_v37, %v1372_v56 }
 0x4d3   :  { %v1387_v59 = vmul.f32 1.442695, %v1381_v57  ;;  %v1385_v51 = vmul.f32 1.442695, %v1380_v58 }
 0x4d4   :  { %v1378_v60 = vpop.xlane.xlu0 %1377  ;;  %v1580_v1 = vpop.permute.xlu1 %1579 }
 0x4d5   :  { %4336 = vpow2.f32 %v1387_v59  ;;  %v1382_v61 = vsub.f32 %v1366_v44, %v1378_v60  ;;  %v158_v59 = vld [vmem:[%s5333_s9] sm:$0xff] }
 0x4d6   :  { %4338 = vpow2.f32 %v1385_v51  ;;  %v159_v51 = vld [vmem:[%s5333_s9 + $0x8] sm:$0xff] }
 0x4d7   :  { %v1389_v62 = vmul.f32 1.442695, %v1382_v61  ;;  %v5040_v60 = vpack.c.bf16 %v159_v51, %v158_v59  ;;  %v3702_v59 = vld [vmem:[%s5336_s12] ss:$0 sm:$0xff] }
 0x4d8   :  { %v1498_v63 = vpop.permute.xlu0 %1497  ;;  %v1662_v6 = vpop.permute.xlu1 %1661 }
 0x4d9   :  { %4340 = vpow2.f32 %v1389_v62  ;;  %3955 = vmatpush3.msra.mxu1 %v1498_v63  ;;  %v160_v63 = vld [vmem:[%s5333_s9 + $0x10] sm:$0xff] }
 0x4da   :  { %3964 = vmatprep.subr.mxu1 %v4622_v16 }
 0x4db   :  { %v4335_v0 = vpop.eup %4334 }
 0x4dc   :  { %3952 = vmatmul.mubr.msk.f32.vlgmr.msra.gmra.mrb[12].mxu0 %vm344_vm2, %v4335_v0  ;;  %v1391_v18 = vsel %vm344_vm2, %v4335_v0, 0.0  ;;  %v161_v0 = vld [vmem:[%s5333_s9 + $0x18] sm:$0xff] }
 0x4dd   :  { %3960 = vmatpush3.msra.mxu0 %v1580_v1  ;;  %3961 = vmatprep.mubr.msk.f32.mxu0 %vm4623_vm1, %v4622_v16 }
 0x4de   :  { %4145 = vmatprep.subr.bf16.mxu0 %v5040_v60 }
 0x4df   :  { %v4337_v2 = vpop.eup %4336 }
 0x4e0   :  { %v4339_v4 = vpop.eup %4338  ;;  %3962 = vmatmul.mubr.msk.f32.vlgmr.msra.gmra.mrb[14].mxu0 %vm344_vm2, %v4337_v2  ;;  %v1397_v5 = vsel %vm344_vm2, %v4337_v2, 0.0 }
 0x4e1   :  { %3957 = vmatmul.mubr.msk.f32.vlgmr.msra.gmra.mrb[16].mxu1 %vm344_vm2, %v4339_v4  ;;  %1398 = vadd.xlane.f32.xlu1 %v1397_v5  ;;  %v1394_v9 = vsel %vm344_vm2, %v4339_v4, 0.0  ;;  %v5049_v5 = vpack.c.bf16 %v161_v0, %v160_v63 }
 0x4e2   :  { %3965 = vmatpush3.msra.mxu1 %v1662_v6  ;;  %1395 = vadd.xlane.f32.xlu0 %v1394_v9 }
 0x4e3   :  { %v4341_v10 = vpop.eup %4340  ;;  %3966 = vmatprep.mubr.msk.f32.mxu1 %vm4623_vm1, %v4622_v16  ;;  %4153 = vmatprep.subr.bf16.mxu1 %v4840_v7 }
 0x4e4   :  { %v1400_v14 = vsel %vm344_vm2, %v4341_v10, 0.0  ;;  %4147 = vmatpush3.bf16.msra.mxu0 %v5040_v60 }
 0x4e5   :  { %3967 = vmatmul.mubr.msk.f32.vlgmr.msra.gmra.mrb[18].mxu1 %vm344_vm2, %v4341_v10  ;;  %691 = vadd.xlane.f32.xlu1 %v690_v11 }
 0x4e6   :  { %1401 = vadd.xlane.f32.xlu0 %v1400_v14  ;;  %4155 = vmatpush3.bf16.msra.mxu1 %v4840_v7 }
 0x4e7   :  { %4157 = vmatprep.subr.bf16.mxu1 %v4845_v12  ;;  %4149 = vmatprep.subr.bf16.mxu0 %v5049_v5 }
 0x4e8   :  { %4151 = vmatpush3.bf16.msra.mxu0 %v5049_v5 }
 0x4e9   :  { %4161 = vmatprep.subr.bf16.mxu0 %v4838_v3 }
 0x4ea   :  { %1392 = vadd.xlane.f32.xlu0 %v1391_v18  ;;  %4159 = vmatpush3.bf16.msra.mxu1 %v4845_v12 }
 0x509   :  { %v698_v19 = vpop.xlane.xlu1 %697  ;;  %v695_v20 = vpop.xlane.xlu0 %694 }
 0x50a   :  { %4342 = vrcp.f32 %v698_v19 }
 0x50b   :  { %4344 = vrcp.f32 %v695_v20 }
 0x50d   :  { %v701_v55 = vpop.xlane.xlu0 %700 }
 0x50e   :  { %4346 = vrcp.f32 %v701_v55 }
 0x514   :  { %v4343_v23 = vpop.eup %4342 }
 0x515   :  { %v4345_v25 = vpop.eup %4344  ;;  %v708_v27 = vmul.f32 %v4343_v23, %v698_v19 }
 0x516   :  { %v707_v28 = vmul.f32 %v4345_v25, %v695_v20 }
 0x517   :  { %v712_v30 = vsub.f32 2.0, %v708_v27 }
 0x518   :  { %v4347_v31 = vpop.eup %4346  ;;  %v711_v7 = vsub.f32 2.0, %v707_v28 }
 0x519   :  { %v709_v32 = vmul.f32 %v4347_v31, %v701_v55  ;;  %v716_v33 = vmul.f32 %v4343_v23, %v712_v30 }
 0x51a   :  { %v715_v34 = vmul.f32 %v4345_v25, %v711_v7 }
 0x51b   :  { %v713_v35 = vsub.f32 2.0, %v709_v32  ;;  %v955_v36 = vmul.f32 %v4982_v26, %v716_v33 }
 0x51c   :  { %v872_v12 = vmul.f32 %v4980_v24, %v715_v34 }
 0x51d   :  { %v717_v37 = vmul.f32 %v4347_v31, %v713_v35  ;;  %957 = vrot.lane.b32.xlu0 %v955_v36, %s4614_s1  ;;  %v5069_v35 = vld [vmem:[%s5334_s10] ss:$0 sm:$0xff] }
 0x51e   :  { %874 = vrot.lane.b32.xlu1 %v872_v12, %s4613_s21 }
 0x51f   :  { %v1038_v38 = vmul.f32 %v4987_v29, %v717_v37 }
 0x522   :  { %1040 = vrot.lane.b32.xlu1 %v1038_v38, %s4631_s3 }
 0x56e   :  { %v1399_v39 = vpop.xlane.xlu1 %1398 }
 0x56f   :  { %v1396_v43 = vpop.xlane.xlu0 %1395 }
 0x572   :  { %v692_v40 = vpop.xlane.xlu1 %691 }
 0x573   :  { %4348 = vrcp.f32 %v692_v40  ;;  %v1402_v45 = vpop.xlane.xlu0 %1401 }
 0x577   :  { %v1393_v46 = vpop.xlane.xlu0 %1392 }
 0x578   :  { %4350 = vrcp.f32 %v1393_v46 }
 0x579   :  { %4352 = vrcp.f32 %v1399_v39 }
 0x57a   :  { %4354 = vrcp.f32 %v1396_v43 }
 0x57b   :  { %4356 = vrcp.f32 %v1402_v45 }
 0x57d   :  { %v4349_v41 = vpop.eup %4348 }
 0x57e   :  { %v706_v42 = vmul.f32 %v4349_v41, %v692_v40 }
 0x580   :  { %v710_v44 = vsub.f32 2.0, %v706_v42 }
 0x582   :  { %v714_v26 = vmul.f32 %v4349_v41, %v710_v44 }
 0x584   :  { %v794_v24 = vmul.f32 %v4978_v22, %v714_v26  ;;  %v4351_v22 = vpop.eup %4350 }
 0x585   :  { %v1407_v50 = vmul.f32 %v4351_v22, %v1393_v46  ;;  %v4353_v52 = vpop.eup %4352 }
 0x586   :  { %795 = vst.msk [vmem:[#allocation2] sm:$0xff] %vm344_vm2, %v794_v24  ;;  %v4355_v53 = vpop.eup %4354  ;;  %v1409_v54 = vmul.f32 %v4353_v52, %v1399_v39 }
 0x587   :  { %v1411_v56 = vsub.f32 2.0, %v1407_v50  ;;  %v1408_v57 = vmul.f32 %v4355_v53, %v1396_v43  ;;  %v4357_v58 = vpop.eup %4356 }
 0x588   :  { %v1413_v61 = vsub.f32 2.0, %v1409_v54  ;;  %v1410_v2 = vmul.f32 %v4357_v58, %v1402_v45 }
 0x589   :  { %v1415_v62 = vmul.f32 %v4351_v22, %v1411_v56  ;;  %v1412_v1 = vsub.f32 2.0, %v1408_v57  ;;  %v3701_v57 = vld [vmem:[%s5335_s11] ss:$0 sm:$0xff] }
 0x58a   :  { %v1417_v10 = vmul.f32 %v4353_v52, %v1413_v61  ;;  %v1414_v11 = vsub.f32 2.0, %v1410_v2 }
 0x58b   :  { %v1416_v14 = vmul.f32 %v4355_v53, %v1412_v1 }
 0x58c   :  { %v1418_v27 = vmul.f32 %v4357_v58, %v1414_v11 }
 0x58f   :  { %v958_v29 = vpop.permute.xlu0 %957 }
 0x590   :  { %v875_v47 = vpop.permute.xlu1 %874 }
 0x591   :  { %878 = vst.msk [vmem:[#allocation2] sm:$0xff] %vm877_vm3, %v875_v47  ;;  %v1880_v47 = vld [vmem:[#allocation8 + $0x8] sm:$0xff] }
 0x592   :  { %961 = vst.msk [vmem:[#allocation2] sm:$0xff] %vm960_vm4, %v958_v29 }
 0x594   :  { %v1041_v48 = vpop.permute.xlu1 %1040 }
 0x595   :  { %1044 = vst.msk [vmem:[#allocation2] sm:$0xff] %vm1043_vm5, %v1041_v48  ;;  %v4632_v48 = vmov 0.0|0.0  }
 0x596   :  { %4168 = vmatprep.subr.bf16.mxu1 %v4632_v48 }
 0x59c   :  { %v1743_v49 = vld [vmem:[#allocation2] sm:$0xff] }
 0x59d   :  { %3977 = vmatprep.mubr.msk.f32.mxu0 %vm175_vm0, %v1743_v49 }
 0x5af   :  { %v1491_v4 = vpop.f32.mrb[12].mxu0 }
 0x5b0   :  { %v1495_v6 = vmul.f32 %v1491_v4, %v1415_v62  ;;  %v3953_v9 = vpop.f32.mrb[13].mxu0 }
 0x5b2   :  { %1496 = vst.msk [vmem:[#allocation2 + $0x8] sm:$0xff] %vm344_vm2, %v1495_v6 }
 0x5b3   :  { %v1651_v18 = vpop.f32.mrb[14].mxu0 }
 0x5b4   :  { %v1569_v19 = vpop.f32.mrb[16].mxu1  ;;  %v1655_v20 = vmul.f32 %v1651_v18, %v1417_v10  ;;  %v3963_v55 = vpop.f32.mrb[15].mxu0  ;;  %v1881_v18 = vld [vmem:[#allocation8 + $0x10] sm:$0xff] }
 0x5b5   :  { %v1573_v23 = vmul.f32 %v1569_v19, %v1416_v14  ;;  %v3958_v25 = vpop.f32.mrb[17].mxu1  ;;  %v1882_v19 = vld [vmem:[#allocation8 + $0x18] sm:$0xff] }
 0x5b6   :  { %1657 = vrot.lane.b32.xlu0 %v1655_v20, %s4614_s1 }
 0x5b7   :  { %1575 = vrot.lane.b32.xlu1 %v1573_v23, %s4613_s21 }
 0x5b8   :  { %v1733_v28 = vpop.f32.mrb[18].mxu1 }
 0x5b9   :  { %v1737_v30 = vmul.f32 %v1733_v28, %v1418_v27  ;;  %v3968_v31 = vpop.f32.mrb[19].mxu1 }
 0x5bb   :  { %1739 = vrot.lane.b32.xlu1 %v1737_v30, %s4631_s3 }
 0x628   :  { %v1658_v7 = vpop.permute.xlu0 %1657 }
 0x629   :  { %v1576_v32 = vpop.permute.xlu1 %1575 }
 0x62a   :  { %1578 = vst.msk [vmem:[#allocation2 + $0x8] sm:$0xff] %vm877_vm3, %v1576_v32 }
 0x62b   :  { %1660 = vst.msk [vmem:[#allocation2 + $0x8] sm:$0xff] %vm960_vm4, %v1658_v7 }
 0x62d   :  { %v1740_v33 = vpop.permute.xlu1 %1739 }
 0x62e   :  { %1742 = vst.msk [vmem:[#allocation2 + $0x8] sm:$0xff] %vm1043_vm5, %v1740_v33 }
 0x635   :  { %v1744_v34 = vld [vmem:[#allocation2 + $0x8] sm:$0xff] }
 0x636   :  { %3978 = vmatmul.mubr.msk.f32.vlgmr.msra.gmra.mrb[16].mxu0 %vm175_vm0, %v1744_v34 }
 0x637   :  { %4163 = vmatpush3.bf16.msra.mxu0 %v4838_v3 }
 0x638   :  { %4165 = vmatprep.subr.bf16.mxu0 %v4842_v8 }
 0x63b   :  { %4167 = vmatpush3.bf16.msra.mxu0 %v4842_v8 }
 0x63c   :  { %4172 = vmatprep.subr.bf16.mxu0 %v4632_v48 }
 0x709   :  { %v3979_v36 = vpop.f32.mrb[16].mxu0 }
 0x70a   :  { %v1829_v12 = vadd.f32 %v3979_v36, %v5069_v35  ;;  %v1823_v37 = vpop.f32.mrb[17].mxu0 }
 0x70b   :  { %v1824_v38 = vadd.f32 %v5069_v35, %v1823_v37 }
 0x70c   :  { %v1833_v39 = vadd.f32 %v1829_v12, %v4859_v15 }
 0x70d   :  { %v1832_v40 = vadd.f32 %v1824_v38, %v4848_v13  ;;  %v1879_v13 = vld [vmem:[#allocation8] sm:$0xff] }
 0x70e   :  { %v1837_v3 = vsel %vm175_vm0, %v1833_v39, 0.0  ;;  %3999 = vmatprep.mubr.msk.f32.mxu0 %vm175_vm0, %v1879_v13 }
 0x70f   :  { %1838 = vadd.xlane.f32.xlu1 %v1837_v3  ;;  %v1834_v8 = vsel %vm175_vm0, %v1832_v40, 0.0  ;;  %4000 = vmatmul.mubr.msk.f32.vlgmr.msra.gmra.mrb[18].mxu0 %vm175_vm0, %v1880_v47 }
 0x710   :  { %1835 = vadd.xlane.f32.xlu0 %v1834_v8  ;;  %4002 = vmatprep.mubr.msk.f32.mxu0 %vm175_vm0, %v1881_v18 }
 0x713   :  { %4003 = vmatmul.mubr.msk.f32.gmra.mrb[20].mxu0 %vm175_vm0, %v1882_v19 }
 0x714   :  { %4016 = vmatprep.mubr.msk.f32.mxu0 %vm4623_vm1, %v4622_v16 }
 0x79c   :  { %v1839_v41 = vpop.xlane.xlu1 %1838 }
 0x79d   :  { %v1842_v42 = vmul.f32 0.03125, %v1839_v41  ;;  %v1836_v43 = vpop.xlane.xlu0 %1835 }
 0x79e   :  { %v1841_v44 = vmul.f32 0.03125, %v1836_v43 }
 0x79f   :  { %v1844_v26 = vsub.f32 %v1833_v39, %v1842_v42 }
 0x7a0   :  { %v1843_v24 = vsub.f32 %v1832_v40, %v1841_v44 }
 0x7a1   :  { %v1846_v29 = vmul.f32 %v1844_v26, %v1844_v26 }
 0x7a2   :  { %v1845_v45 = vmul.f32 %v1843_v24, %v1843_v24 }
 0x7a3   :  { %v1850_v15 = vsel %vm175_vm0, %v1846_v29, 0.0 }
 0x7a4   :  { %v1847_v46 = vsel %vm175_vm0, %v1845_v45, 0.0 }
 0x7a5   :  { %1848 = vadd.xlane.f32.xlu0 %v1847_v46 }
 0x7a9   :  { %1851 = vadd.xlane.f32.xlu0 %v1850_v15 }
 0x7e2   :  { %v4001_v2 = vpop.f32.mrb[18].mxu0 }
 0x7e3   :  { %v2048_v4 = vadd.f32 %v4001_v2, %v4870_v17  ;;  %v2042_v6 = vpop.f32.mrb[19].mxu0 }
 0x7e4   :  { %v2043_v9 = vadd.f32 %v4870_v17, %v2042_v6 }
 0x7e6   :  { %v5095_v10 = vpack.i.bf16 %v2048_v4, %v2043_v9  ;;  %v4169_v11 = vpack.c.bf16 %v2048_v4, %v2043_v9  ;;  %v4004_v34 = vpop.f32.mrb[20].mxu0 }
 0x7e7   :  { %v2052_v36 = vpop.f32.mrb[21].mxu0  ;;  %v5150_v29 = vadd.f32 %v4004_v34, %v4870_v17 }
 0x7e8   :  { %4257 = vrot.lane.b32.xlu1 %v5095_v10, %s4625_s25  ;;  %4262 = vrot.lane.b32.xlu0 %v5095_v10, %s4624_s8  ;;  %v5153_v15 = vadd.f32 %v4870_v17, %v2052_v36 }
 0x7ea   :  { %v5157_v13 = vpack.i.bf16 %v5150_v29, %v5153_v15  ;;  %v4197_v47 = vpack.c.bf16 %v5150_v29, %v5153_v15 }
 0x832   :  { %v1849_v49 = vpop.xlane.xlu0 %1848 }
 0x833   :  { %v1853_v22 = vmul.f32 0.03125, %v1849_v49  ;;  %v3721_v49 = vld [vmem:[#allocation9] ss:$0 sm:$0xff] }
 0x835   :  { %v1855_v50 = vadd.f32 1e-06, %v1853_v22 }
 0x836   :  { %v1852_v52 = vpop.xlane.xlu0 %1851 }
 0x837   :  { %4358 = vrsqrt.f32 %v1855_v50  ;;  %v1854_v53 = vmul.f32 0.03125, %v1852_v52 }
 0x839   :  { %v1856_v54 = vadd.f32 1e-06, %v1854_v53 }
 0x83b   :  { %4360 = vrsqrt.f32 %v1856_v54 }
 0x841   :  { %v4359_v56 = vpop.eup %4358 }
 0x842   :  { %v1859_v58 = vmul.f32 %v4359_v56, %v1843_v24 }
 0x844   :  { %v1868_v51 = vmul.f32 %v3701_v57, %v1859_v58 }
 0x845   :  { %v4361_v61 = vpop.eup %4360 }
 0x846   :  { %v1860_v62 = vmul.f32 %v4361_v61, %v1844_v26  ;;  %v1877_v63 = vadd.f32 %v3702_v59, %v1868_v51 }
 0x848   :  { %v1869_v0 = vmul.f32 %v3701_v57, %v1860_v62  ;;  %3988 = vmatprep.mubr.msk.f32.mxu1 %vm175_vm0, %v1877_v63 }
 0x84a   :  { %v1878_v1 = vadd.f32 %v3702_v59, %v1869_v0 }
 0x84c   :  { %3989 = vmatmul.mubr.msk.f32.vlgmr.msra.gmra.mrb[20].mxu1 %vm175_vm0, %v1878_v1 }
 0x84d   :  { %4009 = vmatprep.mubr.msk.f32.mxu1 %vm4623_vm1, %v4622_v16  ;;  %4171 = vmatpush3.bf16.xpose.msk.msra.mxu1 %vm5099_vm6, %v4169_v11 }
 0x84e   :  { %4176 = vmatprep.subr.bf16.mxu1 %v4632_v48 }
 0x85a   :  { %v4258_v20 = vpop.permute.xlu1 %4257  ;;  %v4263_v27 = vpop.permute.xlu0 %4262 }
 0x85b   :  { %v4260_v55 = vunpack.i.h.bf16 %v4258_v20  ;;  %v4259_v23 = vunpack.i.l.bf16 %v4258_v20  ;;  %v4265_v28 = vunpack.i.h.bf16 %v4263_v27  ;;  %v4264_v30 = vunpack.i.l.bf16 %v4263_v27 }
 0x85d   :  { %v4173_v25 = vpack.c.bf16 %v4260_v55, %v4259_v23  ;;  %v4177_v33 = vpack.c.bf16 %v4265_v28, %v4264_v30 }
 0x85f   :  { %4175 = vmatpush3.bf16.xpose.msk.msra.mxu0 %vm5099_vm6, %v4173_v25 }
 0x860   :  { %4180 = vmatprep.subr.bf16.mxu0 %v4632_v48 }
 0x91f   :  { %v5117_v31 = vpop.f32.mrb[20].mxu1 }
 0x920   :  { %v1955_v7 = vpop.f32.mrb[21].mxu1  ;;  %v1961_v2 = vadd.f32 %v5117_v31, %v4876_v21 }
 0x921   :  { %v1956_v32 = vadd.f32 %v4876_v21, %v1955_v7 }
 0x923   :  { %2222 = vrot.lane.b32.xlu0 %v1956_v32, %s4624_s8  ;;  %2140 = vrot.lane.b32.xlu1 %v1956_v32, %s4625_s25 }
 0x924   :  { %4010 = vmatmul.mubr.msk.f32.vlgmr.msra.gmra.mrb[22].mxu1 %vm344_vm2, %v1956_v32 }
 0x925   :  { %4179 = vmatpush3.bf16.xpose.msk.msra.mxu1 %vm5099_vm6, %v4177_v33  ;;  %4023 = vmatprep.mubr.msk.f32.mxu1 %vm4623_vm1, %v4622_v16 }
 0x926   :  { %4184 = vmatprep.subr.bf16.mxu1 %v4632_v48 }
 0x927   :  { %4267 = vrot.lane.b32.xlu1 %v5095_v10, %s4626_s0 }
 0x92b   :  { %2304 = vrot.lane.b32.xlu1 %v1956_v32, %s4626_s0 }
 0x92f   :  { %4272 = vrot.lane.b32.xlu1 %v5095_v10, %s4627_s24 }
 0x933   :  { %4282 = vrot.lane.b32.xlu1 %v5095_v10, %s4629_s30 }
 0x995   :  { %v2223_v12 = vpop.permute.xlu0 %2222  ;;  %v2141_v37 = vpop.permute.xlu1 %2140 }
 0x996   :  { %4017 = vmatmul.mubr.msk.f32.vlgmr.msra.gmra.mrb[22].mxu0 %vm344_vm2, %v2141_v37  ;;  %4024 = vmatmul.mubr.msk.f32.vlgmr.msra.gmra.mrb[24].mxu1 %vm344_vm2, %v2223_v12 }
 0x997   :  { %4030 = vmatprep.mubr.msk.f32.mxu0 %vm4623_vm1, %v4622_v16  ;;  %4037 = vmatprep.mubr.msk.f32.mxu1 %vm4623_vm1, %v4622_v16 }
 0x999   :  { %v4268_v38 = vpop.permute.xlu1 %4267 }
 0x99a   :  { %v4270_v39 = vunpack.i.h.bf16 %v4268_v38  ;;  %v4269_v40 = vunpack.i.l.bf16 %v4268_v38 }
 0x99c   :  { %v4181_v3 = vpack.c.bf16 %v4270_v39, %v4269_v40 }
 0x99d   :  { %v2305_v8 = vpop.permute.xlu1 %2304 }
 0x99e   :  { %4183 = vmatpush3.bf16.xpose.msk.msra.mxu0 %vm5099_vm6, %v4181_v3 }
 0x99f   :  { %4190 = vmatprep.subr.bf16.mxu0 %v4632_v48 }
 0x9a1   :  { %v4273_v41 = vpop.permute.xlu1 %4272 }
 0x9a2   :  { %v4275_v42 = vunpack.i.h.bf16 %v4273_v41  ;;  %v4274_v43 = vunpack.i.l.bf16 %v4273_v41 }
 0x9a4   :  { %v4185_v44 = vpack.c.bf16 %v4275_v42, %v4274_v43 }
 0x9a5   :  { %v4283_v26 = vpop.permute.xlu1 %4282  ;;  %4031 = vmatmul.mubr.msk.f32.vlgmr.msra.gmra.mrb[24].mxu0 %vm344_vm2, %v2305_v8 }
 0x9a6   :  { %v4285_v24 = vunpack.i.h.bf16 %v4283_v26  ;;  %v4284_v45 = vunpack.i.l.bf16 %v4283_v26  ;;  %4186 = vmatpush3.bf16.msra.mxu1 %v4185_v44  ;;  %4051 = vmatprep.mubr.msk.f32.mxu0 %vm4623_vm1, %v4622_v16 }
 0x9a7   :  { %4187 = vmatprep.subr.bf16.mxu1 %v4632_v48 }
 0x9a8   :  { %v4191_v46 = vpack.c.bf16 %v4285_v24, %v4284_v45 }
 0x9aa   :  { %4192 = vmatpush3.bf16.msra.mxu0 %v4191_v46 }
 0x9ab   :  { %4196 = vmatprep.subr.bf16.mxu0 %v4632_v48 }
 0x9f7   :  { %v2136_v22 = vpop.f32.mrb[22].mxu1 }
 0x9f8   :  { %v2393_v50 = vadd.f32 %v3721_v49, %v2136_v22  ;;  %v4011_v52 = vpop.f32.mrb[23].mxu1 }
 0x9fa   :  { %v2398_v53 = vsel %vm2397_vm7, %v2393_v50, -inf }
 0x9fb   :  { %2399 = vmax.xlane.f32.xlu0 %v2398_v53 }
 0xa11   :  { %4277 = vrot.lane.b32.xlu0 %v5095_v10, %s4628_s29 }
 0xa69   :  { %v2218_v17 = vpop.f32.mrb[22].mxu0  ;;  %v2300_v54 = vpop.f32.mrb[24].mxu1 }
 0xa6a   :  { %v2394_v56 = vadd.f32 %v3721_v49, %v2218_v17  ;;  %v2395_v57 = vadd.f32 %v3721_v49, %v2300_v54  ;;  %v4018_v58 = vpop.f32.mrb[23].mxu0  ;;  %v4025_v59 = vpop.f32.mrb[25].mxu1 }
 0xa6b   :  { %v3738_v58 = vld [vmem:[#allocation9 + $0x1] ss:$0 sm:$0xff] }
 0xa6c   :  { %v2401_v51 = vsel %vm2397_vm7, %v2394_v56, -inf  ;;  %v2404_v61 = vsel %vm2397_vm7, %v2395_v57, -inf }
 0xa6d   :  { %2402 = vmax.xlane.f32.xlu1 %v2401_v51  ;;  %2405 = vmax.xlane.f32.xlu0 %v2404_v61 }
 0xa78   :  { %v2382_v62 = vpop.f32.mrb[24].mxu0 }
 0xa79   :  { %v2396_v63 = vadd.f32 %v3721_v49, %v2382_v62  ;;  %v4032_v0 = vpop.f32.mrb[25].mxu0 }
 0xa7b   :  { %v2407_v1 = vsel %vm2397_vm7, %v2396_v63, -inf }
 0xa7c   :  { %2408 = vmax.xlane.f32.xlu0 %v2407_v1 }
 0xa7e   :  { %4287 = vrot.lane.b32.xlu1 %v5095_v10, %s4630_s14 }
 0xa82   :  { %4297 = vrot.lane.b32.xlu1 %v5157_v13, %s4624_s8 }
 0xa86   :  { %2865 = vrot.lane.b32.xlu1 %v1961_v2, %s4625_s25 }
 0xa88   :  { %v2400_v4 = vpop.xlane.xlu0 %2399 }
 0xa89   :  { %v2410_v6 = vsub.f32 %v2393_v50, %v2400_v4 }
 0xa8a   :  { %3029 = vrot.lane.b32.xlu1 %v1961_v2, %s4626_s0 }
 0xa8b   :  { %v2414_v9 = vmul.f32 1.442695, %v2410_v6 }
 0xa8c   :  { %v4278_v11 = vpop.permute.xlu0 %4277 }
 0xa8d   :  { %4362 = vpow2.f32 %v2414_v9  ;;  %v4280_v10 = vunpack.i.h.bf16 %v4278_v11  ;;  %v4279_v18 = vunpack.i.l.bf16 %v4278_v11 }
 0xa8e   :  { %4307 = vrot.lane.b32.xlu1 %v5157_v13, %s4627_s24  ;;  %s4633_s24 = smov [#allocation17]  }
 0xa8f   :  { %v4188_v19 = vpack.c.bf16 %v4280_v10, %v4279_v18 }
 0xa92   :  { %4292 = vrot.lane.b32.xlu0 %v5157_v13, %s4625_s25 }
 0xa96   :  { %4302 = vrot.lane.b32.xlu0 %v5157_v13, %s4626_s0 }
 0xa97   :  { %v5181_v21 = vpop.eup %4362 }
 0xa98   :  { %4038 = vmatmul.mubr.msk.f32.vlgmr.msra.gmra.mrb[26].mxu1 %vm2397_vm7, %v5181_v21 }
 0xa99   :  { %4189 = vmatpush3.bf16.msra.mxu1 %v4188_v19  ;;  %4044 = vmatprep.mubr.msk.f32.mxu1 %vm4623_vm1, %v4622_v16 }
 0xa9a   :  { %2947 = vrot.lane.b32.xlu0 %v1961_v2, %s4624_s8  ;;  %4193 = vmatprep.subr.bf16.mxu1 %v4632_v48 }
 0xafa   :  { %v2403_v20 = vpop.xlane.xlu1 %2402  ;;  %v2406_v55 = vpop.xlane.xlu0 %2405 }
 0xafb   :  { %v2411_v23 = vsub.f32 %v2394_v56, %v2403_v20  ;;  %v2412_v25 = vsub.f32 %v2395_v57, %v2406_v55 }
 0xafd   :  { %v2416_v27 = vmul.f32 1.442695, %v2411_v23  ;;  %v2418_v28 = vmul.f32 1.442695, %v2412_v25 }
 0xafe   :  { %v4288_v30 = vpop.permute.xlu1 %4287 }
 0xaff   :  { %4364 = vpow2.f32 %v2416_v27  ;;  %v4290_v7 = vunpack.i.h.bf16 %v4288_v30  ;;  %v4289_v32 = vunpack.i.l.bf16 %v4288_v30 }
 0xb00   :  { %4366 = vpow2.f32 %v2418_v28 }
 0xb01   :  { %v4194_v36 = vpack.c.bf16 %v4290_v7, %v4289_v32 }
 0xb02   :  { %v4298_v31 = vpop.permute.xlu1 %4297 }
 0xb03   :  { %v4300_v3 = vunpack.i.h.bf16 %v4298_v31  ;;  %v4299_v8 = vunpack.i.l.bf16 %v4298_v31 }
 0xb05   :  { %v4205_v42 = vpack.c.bf16 %v4300_v3, %v4299_v8 }
 0xb06   :  { %v2866_v33 = vpop.permute.xlu1 %2865 }
 0xb09   :  { %v5189_v34 = vpop.eup %4364  ;;  %v2409_v12 = vpop.xlane.xlu0 %2408 }
 0xb0a   :  { %v5191_v37 = vpop.eup %4366  ;;  %v2413_v38 = vsub.f32 %v2396_v63, %v2409_v12  ;;  %4045 = vmatmul.mubr.msk.f32.vlgmr.msra.gmra.mrb[28].mxu1 %vm2397_vm7, %v5189_v34  ;;  %v3030_v40 = vpop.permute.xlu1 %3029  ;;  %v2425_v27 = vsel %vm2397_vm7, %v5189_v34, 0.0 }
 0xb0b   :  { %4052 = vmatmul.mubr.msk.f32.vlgmr.msra.gmra.mrb[26].mxu0 %vm2397_vm7, %v5191_v37  ;;  %4195 = vmatpush3.bf16.msra.mxu1 %v4194_v36  ;;  %v2428_v25 = vsel %vm2397_vm7, %v5191_v37, 0.0 }
 0xb0c   :  { %v2420_v39 = vmul.f32 1.442695, %v2413_v38  ;;  %4199 = vmatpush3.bf16.xpose.msk.msra.mxu0 %vm5099_vm6, %v4197_v47  ;;  %4065 = vmatprep.mubr.msk.f32.mxu0 %vm4623_vm1, %v4622_v16 }
 0xb0d   :  { %4204 = vmatprep.subr.bf16.mxu0 %v4632_v48  ;;  %4058 = vmatprep.mubr.msk.f32.mxu1 %vm4623_vm1, %v4622_v16  ;;  %v4293_v41 = vpop.permute.xlu0 %4292 }
 0xb0e   :  { %4368 = vpow2.f32 %v2420_v39  ;;  %4200 = vmatprep.subr.bf16.mxu1 %v4632_v48  ;;  %v4308_v43 = vpop.permute.xlu1 %4307  ;;  %v4295_v44 = vunpack.i.h.bf16 %v4293_v41  ;;  %v4294_v26 = vunpack.i.l.bf16 %v4293_v41 }
 0xb0f   :  { %v4310_v45 = vunpack.i.h.bf16 %v4308_v43  ;;  %v4309_v46 = vunpack.i.l.bf16 %v4308_v43 }
 0xb10   :  { %v4201_v15 = vpack.c.bf16 %v4295_v44, %v4294_v26 }
 0xb11   :  { %v4303_v24 = vpop.permute.xlu0 %4302  ;;  %v4213_v47 = vpack.c.bf16 %v4310_v45, %v4309_v46 }
 0xb12   :  { %v4305_v22 = vunpack.i.h.bf16 %v4303_v24  ;;  %v4304_v50 = vunpack.i.l.bf16 %v4303_v24 }
 0xb13   :  { %4066 = vmatmul.mubr.msk.f32.vlgmr.msra.gmra.mrb[28].mxu0 %vm344_vm2, %v1961_v2 }
 0xb14   :  { %4207 = vmatpush3.bf16.xpose.msk.msra.mxu0 %vm5099_vm6, %v4205_v42  ;;  %4079 = vmatprep.mubr.msk.f32.mxu0 %vm4623_vm1, %v4622_v16  ;;  %v4209_v52 = vpack.c.bf16 %v4305_v22, %v4304_v50 }
 0xb15   :  { %4212 = vmatprep.subr.bf16.mxu0 %v4632_v48  ;;  %v2948_v49 = vpop.permute.xlu0 %2947 }
 0xb18   :  { %v4369_v29 = vpop.eup %4368 }
 0xb19   :  { %4059 = vmatmul.mubr.msk.f32.vlgmr.msra.gmra.mrb[30].mxu1 %vm2397_vm7, %v4369_v29  ;;  %v2431_v28 = vsel %vm2397_vm7, %v4369_v29, 0.0  ;;  %v2422_v29 = vsel %vm2397_vm7, %v5181_v21, 0.0 }
 0xb1a   :  { %4203 = vmatpush3.bf16.xpose.msk.msra.mxu1 %vm5099_vm6, %v4201_v15  ;;  %4072 = vmatprep.mubr.msk.f32.mxu1 %vm4623_vm1, %v4622_v16 }
 0xb1b   :  { %4080 = vmatmul.mubr.msk.f32.vlgmr.msra.gmra.mrb[30].mxu0 %vm344_vm2, %v2948_v49  ;;  %4208 = vmatprep.subr.bf16.mxu1 %v4632_v48 }
 0xb1c   :  { %4214 = vmatpush3.bf16.msra.mxu0 %v4213_v47  ;;  %4093 = vmatprep.mubr.msk.f32.mxu0 %vm4623_vm1, %v4622_v16 }
 0xb1d   :  { %4218 = vmatprep.subr.bf16.mxu0 %v4632_v48 }
 0xb21   :  { %4073 = vmatmul.mubr.msk.f32.vlgmr.msra.gmra.mrb[32].mxu1 %vm344_vm2, %v2866_v33 }
 0xb22   :  { %4211 = vmatpush3.bf16.xpose.msk.msra.mxu1 %vm5099_vm6, %v4209_v52  ;;  %4086 = vmatprep.mubr.msk.f32.mxu1 %vm4623_vm1, %v4622_v16 }
 0xb23   :  { %4215 = vmatprep.subr.bf16.mxu1 %v4632_v48 }
 0xb29   :  { %4087 = vmatmul.mubr.msk.f32.vlgmr.msra.gmra.mrb[34].mxu1 %vm344_vm2, %v3030_v40 }
 0xb2a   :  { %4100 = vmatprep.mubr.msk.f32.mxu1 %vm4623_vm1, %v4622_v16 }
 0xb6b   :  { %v5233_v53 = vpop.f32.mrb[26].mxu1 }
 0xb6c   :  { %v4039_v17 = vpop.f32.mrb[27].mxu1 }
 0xbdd   :  { %v5235_v54 = vpop.f32.mrb[28].mxu1 }
 0xbde   :  { %v5237_v56 = vpop.f32.mrb[26].mxu0  ;;  %v4046_v57 = vpop.f32.mrb[29].mxu1 }
 0xbdf   :  { %v4053_v14 = vpop.f32.mrb[27].mxu0 }
 0xbe6   :  { %v2861_v59 = vpop.f32.mrb[28].mxu0 }
 0xbe7   :  { %v3119_v51 = vadd.f32 %v3738_v58, %v2861_v59  ;;  %v4067_v61 = vpop.f32.mrb[29].mxu0 }
 0xbe9   :  { %v3123_v62 = vsel %vm2397_vm7, %v3119_v51, -inf }
 0xbea   :  { %3124 = vmax.xlane.f32.xlu0 %v3123_v62 }
 0xbec   :  { %v5240_v63 = vpop.f32.mrb[30].mxu1 }
 0xbed   :  { %v4060_v0 = vpop.f32.mrb[31].mxu1 }
 0xbee   :  { %v3025_v1 = vpop.f32.mrb[30].mxu0 }
 0xbef   :  { %v3121_v2 = vadd.f32 %v3738_v58, %v3025_v1  ;;  %v4081_v4 = vpop.f32.mrb[31].mxu0 }
 0xbf1   :  { %v3129_v6 = vsel %vm2397_vm7, %v3121_v2, -inf }
 0xbf2   :  { %3130 = vmax.xlane.f32.xlu0 %v3129_v6 }
 0xbf4   :  { %v2943_v9 = vpop.f32.mrb[32].mxu1 }
 0xbf5   :  { %v3120_v11 = vadd.f32 %v3738_v58, %v2943_v9  ;;  %v4074_v10 = vpop.f32.mrb[33].mxu1 }
 0xbf7   :  { %v3126_v18 = vsel %vm2397_vm7, %v3120_v11, -inf }
 0xbf8   :  { %3127 = vmax.xlane.f32.xlu1 %v3126_v18 }
 0xbfc   :  { %v3107_v19 = vpop.f32.mrb[34].mxu1 }
 0xbfd   :  { %v3122_v20 = vadd.f32 %v3738_v58, %v3107_v19  ;;  %v4088_v55 = vpop.f32.mrb[35].mxu1 }
 0xbff   :  { %v3132_v23 = vsel %vm2397_vm7, %v3122_v20, -inf }
 0xc00   :  { %3133 = vmax.xlane.f32.xlu0 %v3132_v23 }
 0xc09   :  { %4317 = vrot.lane.b32.xlu1 %v5157_v13, %s4629_s30 }
 0xc0d   :  { %4322 = vrot.lane.b32.xlu1 %v5157_v13, %s4630_s14 }
 0xc16   :  { %4312 = vrot.lane.b32.xlu0 %v5157_v13, %s4628_s29  ;;  %s3649_s29 = sshll.u32 %s4633_s24, 4  ;;  %s3650_s29 = int_to_ptr.vmem [resolvable:$true] %s3649_s29 }
 0xc17   :  { %s4576_s30 = scalar_lea.vmem %s3650_s29, 256  ;;  %p4581_p9 = scmp.lt.s32.totalorder %s3650_s29, %s3650_s29 }
 0xc18   :  { %p4577_p8 = scmp.ne.s32.totalorder %s3650_s29, %s4576_s30  ;;  %p4582_p10 = scmp.lt.s32.totalorder %s4576_s30, %s4576_s30 }
 0xc1a   :  { %p4583_p11 = por %p4582_p10, %p4581_p9 }
 0xc1c   :  { %p4584_p12 = pnand %p4583_p11, %p4577_p8 }
 0xc31   :  { %2429 = vadd.xlane.f32.xlu1 %v2428_v25 }
 0xc35   :  { %2426 = vadd.xlane.f32.xlu0 %v2425_v27 }
 0xc39   :  { %2432 = vadd.xlane.f32.xlu0 %v2431_v28 }
 0xc77   :  { %v3125_v30 = vpop.xlane.xlu0 %3124 }
 0xc78   :  { %v3135_v31 = vsub.f32 %v3119_v51, %v3125_v30 }
 0xc7a   :  { %v3139_v7 = vmul.f32 1.442695, %v3135_v31 }
 0xc7c   :  { %4370 = vpow2.f32 %v3139_v7 }
 0xc7f   :  { %v3131_v32 = vpop.xlane.xlu0 %3130 }
 0xc80   :  { %v3137_v33 = vsub.f32 %v3121_v2, %v3131_v32 }
 0xc82   :  { %v3143_v36 = vmul.f32 1.442695, %v3137_v33 }
 0xc84   :  { %4372 = vpow2.f32 %v3143_v36 }
 0xc85   :  { %v3128_v13 = vpop.xlane.xlu1 %3127 }
 0xc86   :  { %v4371_v12 = vpop.eup %4370  ;;  %v3136_v38 = vsub.f32 %v3120_v11, %v3128_v13 }
 0xc87   :  { %4094 = vmatmul.mubr.msk.f32.vlgmr.msra.gmra.mrb[32].mxu0 %vm2397_vm7, %v4371_v12  ;;  %v3147_v17 = vsel %vm2397_vm7, %v4371_v12, 0.0 }
 0xc88   :  { %v3141_v37 = vmul.f32 1.442695, %v3136_v38  ;;  %4107 = vmatprep.mubr.msk.f32.mxu0 %vm4623_vm1, %v4622_v16 }
 0xc89   :  { %v4318_v34 = vpop.permute.xlu1 %4317 }
 0xc8a   :  { %4374 = vpow2.f32 %v3141_v37  ;;  %v4320_v39 = vunpack.i.h.bf16 %v4318_v34  ;;  %v4319_v40 = vunpack.i.l.bf16 %v4318_v34 }
 0xc8c   :  { %v4219_v3 = vpack.c.bf16 %v4320_v39, %v4319_v40 }
 0xc8d   :  { %v3134_v8 = vpop.xlane.xlu0 %3133  ;;  %v4323_v26 = vpop.permute.xlu1 %4322 }
 0xc8e   :  { %v4373_v41 = vpop.eup %4372  ;;  %v3138_v42 = vsub.f32 %v3122_v20, %v3134_v8  ;;  %4220 = vmatpush3.bf16.msra.mxu0 %v4219_v3  ;;  %v4325_v47 = vunpack.i.h.bf16 %v4323_v26  ;;  %v4324_v49 = vunpack.i.l.bf16 %v4323_v26 }
 0xc8f   :  { %v3153_v43 = vsel %vm2397_vm7, %v4373_v41, 0.0  ;;  %4225 = vmatprep.subr.bf16.mxu0 %v5040_v60 }
 0xc90   :  { %v3145_v44 = vmul.f32 1.442695, %v3138_v42  ;;  %3154 = vadd.xlane.f32.xlu1 %v3153_v43  ;;  %v4222_v52 = vpack.c.bf16 %v4325_v47, %v4324_v49 }
 0xc91   :  { %4108 = vmatmul.mubr.msk.f32.vlgmr.msra.gmra.mrb[34].mxu0 %vm2397_vm7, %v4373_v41  ;;  %v4313_v24 = vpop.permute.xlu0 %4312 }
 0xc92   :  { %4376 = vpow2.f32 %v3145_v44  ;;  %v4315_v45 = vunpack.i.h.bf16 %v4313_v24  ;;  %v4314_v46 = vunpack.i.l.bf16 %v4313_v24  ;;  %4227 = vmatpush3.bf16.msra.mxu0 %v5040_v60 }
 0xc93   :  { %4229 = vmatprep.subr.bf16.mxu0 %v5049_v5 }
 0xc94   :  { %v4375_v15 = vpop.eup %4374  ;;  %v4216_v22 = vpack.c.bf16 %v4315_v45, %v4314_v46  ;;  %2423 = vadd.xlane.f32.xlu1 %v2422_v29 }
 0xc95   :  { %v3150_v50 = vsel %vm2397_vm7, %v4375_v15, 0.0 }
 0xc96   :  { %3151 = vadd.xlane.f32.xlu0 %v3150_v50  ;;  %4217 = vmatpush3.bf16.msra.mxu1 %v4216_v22 }
 0xc97   :  { %4221 = vmatprep.subr.bf16.mxu1 %v4632_v48  ;;  %4231 = vmatpush3.bf16.msra.mxu0 %v5049_v5 }
 0xc99   :  { %4101 = vmatmul.mubr.msk.f32.vlgmr.msra.gmra.mrb[36].mxu1 %vm2397_vm7, %v4375_v15 }
 0xc9a   :  { %4223 = vmatpush3.bf16.msra.mxu1 %v4222_v52  ;;  %4114 = vmatprep.mubr.msk.f32.mxu1 %vm4623_vm1, %v4622_v16 }
 0xc9c   :  { %v4377_v60 = vpop.eup %4376 }
 0xc9d   :  { %4115 = vmatmul.mubr.msk.f32.vlgmr.msra.gmra.mrb[38].mxu1 %vm2397_vm7, %v4377_v60  ;;  %v3156_v21 = vsel %vm2397_vm7, %v4377_v60, 0.0 }
 0xc9e   :  { %3157 = vadd.xlane.f32.xlu0 %v3156_v21 }
 0xca2   :  { %3148 = vadd.xlane.f32.xlu0 %v3147_v17 }
 0xcbe   :  { %v2430_v57 = vpop.xlane.xlu1 %2429 }
 0xcbf   :  { %4378 = vrcp.f32 %v2430_v57 }
 0xcc2   :  { %v2427_v48 = vpop.xlane.xlu0 %2426 }
 0xcc3   :  { %4380 = vrcp.f32 %v2427_v48 }
 0xcc6   :  { %v2433_v5 = vpop.xlane.xlu0 %2432 }
 0xcc7   :  { %4382 = vrcp.f32 %v2433_v5 }
 0xcc9   :  { %v4379_v14 = vpop.eup %4378 }
 0xcca   :  { %v2440_v58 = vmul.f32 %v4379_v14, %v2430_v57 }
 0xccc   :  { %v2444_v59 = vsub.f32 2.0, %v2440_v58 }
 0xccd   :  { %v4381_v51 = vpop.eup %4380 }
 0xcce   :  { %v2439_v16 = vmul.f32 %v4381_v51, %v2427_v48  ;;  %v2448_v61 = vmul.f32 %v4379_v14, %v2444_v59  ;;  %v4398_v59 = vld [vmem:[#allocation3 + $0x8] sm:$0xff] }
 0xcd0   :  { %v2443_v62 = vsub.f32 2.0, %v2439_v16  ;;  %v2695_v0 = vmul.f32 %v5237_v56, %v2448_v61  ;;  %v4399_v16 = vld [vmem:[#allocation3] sm:$0xff] }
 0xcd1   :  { %v4383_v1 = vpop.eup %4382 }
 0xcd2   :  { %v2441_v2 = vmul.f32 %v4383_v1, %v2433_v5  ;;  %2697 = vrot.lane.b32.xlu0 %v2695_v0, %s4614_s1  ;;  %v2447_v4 = vmul.f32 %v4381_v51, %v2443_v62 }
 0xcd4   :  { %v2445_v6 = vsub.f32 2.0, %v2441_v2  ;;  %v2610_v9 = vmul.f32 %v5235_v54, %v2447_v4 }
 0xcd6   :  { %v2449_v11 = vmul.f32 %v4383_v1, %v2445_v6  ;;  %2612 = vrot.lane.b32.xlu1 %v2610_v9, %s4613_s21 }
 0xcd8   :  { %v2780_v10 = vmul.f32 %v5240_v63, %v2449_v11 }
 0xcda   :  { %2782 = vrot.lane.b32.xlu1 %v2780_v10, %s4631_s3 }
 0xd1d   :  { %v3155_v18 = vpop.xlane.xlu1 %3154 }
 0xd21   :  { %v2424_v19 = vpop.xlane.xlu1 %2423 }
 0xd22   :  { %4384 = vrcp.f32 %v2424_v19 }
 0xd23   :  { %v3152_v27 = vpop.xlane.xlu0 %3151 }
 0xd2b   :  { %v3158_v54 = vpop.xlane.xlu0 %3157 }
 0xd2c   :  { %v4385_v20 = vpop.eup %4384 }
 0xd2d   :  { %v2438_v56 = vmul.f32 %v4385_v20, %v2424_v19 }
 0xd2f   :  { %v2442_v55 = vsub.f32 2.0, %v2438_v56  ;;  %v3149_v28 = vpop.xlane.xlu0 %3148 }
 0xd30   :  { %4386 = vrcp.f32 %v3149_v28 }
 0xd31   :  { %v2446_v23 = vmul.f32 %v4385_v20, %v2442_v55  ;;  %4388 = vrcp.f32 %v3155_v18 }
 0xd32   :  { %4390 = vrcp.f32 %v3152_v27 }
 0xd33   :  { %v2529_v25 = vmul.f32 %v5233_v53, %v2446_v23  ;;  %4392 = vrcp.f32 %v3158_v54 }
 0xd35   :  { %2530 = vst.msk [vmem:[#allocation2] sm:$0xff] %vm344_vm2, %v2529_v25 }
 0xd3a   :  { %v4387_v7 = vpop.eup %4386 }
 0xd3b   :  { %v3163_v32 = vmul.f32 %v4387_v7, %v3149_v28  ;;  %v4389_v36 = vpop.eup %4388  ;;  %v3746_v28 = vld [vmem:[%s5335_s11 + $0x1] ss:$0 sm:$0xff] }
 0xd3c   :  { %v3165_v38 = vmul.f32 %v4389_v36, %v3155_v18  ;;  %v4391_v40 = vpop.eup %4390 }
 0xd3d   :  { %v3167_v53 = vsub.f32 2.0, %v3163_v32  ;;  %v3164_v3 = vmul.f32 %v4391_v40, %v3152_v27  ;;  %v4393_v41 = vpop.eup %4392 }
 0xd3e   :  { %v3169_v39 = vsub.f32 2.0, %v3165_v38  ;;  %v3166_v24 = vmul.f32 %v4393_v41, %v3158_v54 }
 0xd3f   :  { %v3171_v13 = vmul.f32 %v4387_v7, %v3167_v53  ;;  %v3168_v26 = vsub.f32 2.0, %v3164_v3 }
 0xd40   :  { %v3173_v8 = vmul.f32 %v4389_v36, %v3169_v39  ;;  %v3170_v45 = vsub.f32 2.0, %v3166_v24 }
 0xd41   :  { %v3172_v46 = vmul.f32 %v4391_v40, %v3168_v26 }
 0xd42   :  { %v3174_v49 = vmul.f32 %v4393_v41, %v3170_v45 }
 0xd44   :  { %v2698_v31 = vpop.permute.xlu0 %2697 }
 0xd48   :  { %v2613_v30 = vpop.permute.xlu1 %2612 }
 0xd49   :  { %2615 = vst.msk [vmem:[#allocation2] sm:$0xff] %vm877_vm3, %v2613_v30 }
 0xd4a   :  { %2700 = vst.msk [vmem:[#allocation2] sm:$0xff] %vm960_vm4, %v2698_v31  ;;  %v3748_v31 = vld [vmem:[%s5336_s12 + $0x1] ss:$0 sm:$0xff] }
 0xd4c   :  { %v2783_v63 = vpop.permute.xlu1 %2782 }
 0xd4d   :  { %2785 = vst.msk [vmem:[#allocation2] sm:$0xff] %vm1043_vm5, %v2783_v63 }
 0xd54   :  { %v3511_v33 = vld [vmem:[#allocation2] sm:$0xff] }
 0xd55   :  { %4125 = vmatprep.mubr.msk.f32.mxu0 %vm175_vm0, %v3511_v33 }
 0xd5a   :  { %v3250_v12 = vpop.f32.mrb[32].mxu0 }
 0xd5b   :  { %v3254_v37 = vmul.f32 %v3250_v12, %v3171_v13  ;;  %v4095_v34 = vpop.f32.mrb[33].mxu0 }
 0xd5d   :  { %3255 = vst.msk [vmem:[#allocation2 + $0x8] sm:$0xff] %vm344_vm2, %v3254_v37 }
 0xd64   :  { %v3416_v42 = vpop.f32.mrb[34].mxu0 }
 0xd65   :  { %v3420_v43 = vmul.f32 %v3416_v42, %v3173_v8  ;;  %v4109_v44 = vpop.f32.mrb[35].mxu0 }
 0xd67   :  { %3422 = vrot.lane.b32.xlu0 %v3420_v43, %s4614_s1 }
 0xd6c   :  { %v3331_v29 = vpop.f32.mrb[36].mxu1 }
 0xd6d   :  { %v3335_v15 = vmul.f32 %v3331_v29, %v3172_v46  ;;  %v4102_v47 = vpop.f32.mrb[37].mxu1 }
 0xd6f   :  { %3337 = vrot.lane.b32.xlu1 %v3335_v15, %s4613_s21 }
 0xd70   :  { %v3501_v22 = vpop.f32.mrb[38].mxu1 }
 0xd71   :  { %v3505_v50 = vmul.f32 %v3501_v22, %v3174_v49  ;;  %v4116_v52 = vpop.f32.mrb[39].mxu1 }
 0xd73   :  { %3507 = vrot.lane.b32.xlu1 %v3505_v50, %s4631_s3 }
 0xdd9   :  { %v3423_v21 = vpop.permute.xlu0 %3422 }
 0xde1   :  { %v3338_v60 = vpop.permute.xlu1 %3337 }
 0xde2   :  { %3340 = vst.msk [vmem:[#allocation2 + $0x8] sm:$0xff] %vm877_vm3, %v3338_v60 }
 0xde3   :  { %3425 = vst.msk [vmem:[#allocation2 + $0x8] sm:$0xff] %vm960_vm4, %v3423_v21 }
 0xde5   :  { %v3508_v17 = vpop.permute.xlu1 %3507 }
 0xde6   :  { %3510 = vst.msk [vmem:[#allocation2 + $0x8] sm:$0xff] %vm1043_vm5, %v3508_v17 }
 0xded   :  { %v3512_v57 = vld [vmem:[#allocation2 + $0x8] sm:$0xff] }
 0xdee   :  { %4126 = vmatmul.mubr.msk.f32.vlgmr.msra.gmra.mrb[36].mxu0 %vm175_vm0, %v3512_v57 }
 0xec1   :  { %v4127_v48 = vpop.f32.mrb[36].mxu0 }
 0xec2   :  { %v3591_v5 = vadd.f32 %v4127_v48, %v5069_v35  ;;  %v3585_v14 = vpop.f32.mrb[37].mxu0 }
 0xec3   :  { %v3586_v58 = vadd.f32 %v5069_v35, %v3585_v14 }
 0xec4   :  { %v3595_v51 = vadd.f32 %v4398_v59, %v3591_v5 }
 0xec5   :  { %v3594_v61 = vadd.f32 %v4399_v16, %v3586_v58 }
 0xec6   :  { %v3599_v62 = vsel %vm175_vm0, %v3595_v51, 0.0 }
 0xec7   :  { %3600 = vadd.xlane.f32.xlu1 %v3599_v62  ;;  %v3596_v0 = vsel %vm175_vm0, %v3594_v61, 0.0 }
 0xec8   :  { %3597 = vadd.xlane.f32.xlu0 %v3596_v0 }
 0xf54   :  { %v3601_v1 = vpop.xlane.xlu1 %3600 }
 0xf55   :  { %v3603_v2 = vmul.f32 0.03125, %v3601_v1  ;;  %v3598_v4 = vpop.xlane.xlu0 %3597 }
 0xf56   :  { %v3602_v6 = vmul.f32 0.03125, %v3598_v4 }
 0xf57   :  { %v3605_v9 = vsub.f32 %v3595_v51, %v3603_v2 }
 0xf58   :  { %v3604_v11 = vsub.f32 %v3594_v61, %v3602_v6 }
 0xf59   :  { %v3607_v35 = vmul.f32 %v3605_v9, %v3605_v9 }
 0xf5a   :  { %v3606_v10 = vmul.f32 %v3604_v11, %v3604_v11 }
 0xf5b   :  { %v3611_v19 = vsel %vm175_vm0, %v3607_v35, 0.0 }
 0xf5c   :  { %v3608_v18 = vsel %vm175_vm0, %v3606_v10, 0.0 }
 0xf5d   :  { %3609 = vadd.xlane.f32.xlu0 %v3608_v18 }
 0xf61   :  { %3612 = vadd.xlane.f32.xlu0 %v3611_v19 }
 0xfea   :  { %v3610_v20 = vpop.xlane.xlu0 %3609 }
 0xfeb   :  { %v3614_v56 = vmul.f32 0.03125, %v3610_v20 }
 0xfed   :  { %v3616_v55 = vadd.f32 1e-06, %v3614_v56 }
 0xfee   :  { %v3613_v23 = vpop.xlane.xlu0 %3612 }
 0xfef   :  { %4394 = vrsqrt.f32 %v3616_v55  ;;  %v3615_v25 = vmul.f32 0.03125, %v3613_v23 }
 0xff1   :  { %v3617_v27 = vadd.f32 1e-06, %v3615_v25 }
 0xff3   :  { %4396 = vrsqrt.f32 %v3617_v27 }
 0xff9   :  { %v4395_v54 = vpop.eup %4394 }
 0xffa   :  { %v3620_v30 = vmul.f32 %v4395_v54, %v3604_v11 }
 0xffc   :  { %v3630_v63 = vmul.f32 %v3746_v28, %v3620_v30 }
 0xffd   :  { %v4397_v7 = vpop.eup %4396 }
 0xffe   :  { %v3621_v32 = vmul.f32 %v4397_v7, %v3605_v9  ;;  %v3640_v33 = vadd.f32 %v3748_v31, %v3630_v63 }
0x1000   :  { %v3631_v53 = vmul.f32 %v3746_v28, %v3621_v32  ;;  %3642 = vst.msk [vmem:[#allocation17] sm:$0xff] %vm175_vm0, %v3640_v33 }
0x1002   :  { %v3641_v36 = vadd.f32 %v3748_v31, %v3631_v53 }
0x1004   :  { %3643 = vst.msk [vmem:[#allocation17 + $0x8] sm:$0xff] %vm175_vm0, %v3641_v36 }
0x1005   :  { %4587 = shalt.err (!%p4584_p12)
}
0x1006   :  { %s4588_s14 = scalar_lea.hbm %s5337_s13, 256 }
0x1007   :  { %p4589_p13 = scmp.ne.s32.totalorder %s5337_s13, %s4588_s14  ;;  %p4592_p0 = scmp.lt.u32.totalorder %s4588_s14, %s5337_s13 }
0x1009   :  { %p4594_p1 = pnand %p4592_p0, %p4589_p13 }
0x100b   :  { %4597 = shalt.err (!%p4594_p1)
}
0x100c   :  { %3655 = dma.vmem_to_hbm [thread:$0]  %s3650_s29, 256, %s5337_s13, [#allocation5], %s4612_s20, %s4612_s20, %s4613_s21  }
0x100d   :  { %4608 = dma.done.wait [#allocation5], 256  }
0x100e   :  { %4609 = vsyncadd [#allocation5], 4294967040 }
0x100f   :  { %3659 = vsyncpa [#allocation4], 1 }
0x1010   :  { %3660 = vsyncpa [#allocation7], 1 }
0x1011   :  { %3661 = vsyncpa [#allocation10], 1 }
0x1012   :  { %3662 = vsyncpa [#allocation13], 1 }
0x1013   :  { %3663 = vsyncpa [#allocation16], 1 }
0x1014   :  { %3664 = vsyncpa [#allocation5], 1 }

</bundles_post_ra>
